<compile_context>
chip_gen: v5e
topology: v5e:2x2
jax: 0.10.0
libtpu: 0.0.40
codegen_flags: <defaults>
</compile_context>

<pallas_src>
import functools

import jax
import jax.numpy as jnp
from jax.experimental import pallas as pl
from jax.experimental.pallas import tpu as pltpu


# ---------------- Fused Pallas kernel ----------------

def _fused_kernel(xseq_ref, inp_ref, w_ref, out_ref, *,
                  t_steps, np_rows, k_atoms, kc, kh1, h2, offs):
    o_w1, o_b1, o_w2, o_b2, o_wih, o_whh, o_br, o_wt = offs
    G = 4 * h2

    def mm(a, b):
        return jnp.dot(a, b, preferred_element_type=jnp.float32)

    def sigmoid(x):
        # 0.5*(1 + tanh(x/2)): exact, keeps the divide off the VPU; tanh lives on the EUP.
        return 0.5 * (jnp.tanh(0.5 * x) + 1.0)

    # ---- Stage 1: per-atom 2-layer MLP on all (t, n) rows at once.
    # Block-diagonal (kron) weights land the result directly in the (time, atom*H1)
    # sequence layout -> no in-kernel reshape/relayout.
    x = xseq_ref[...]                                                    # (T*NP, K*C)
    h1 = jnp.maximum(mm(x, w_ref[o_w1:o_w1 + kc, :kh1])
                     + w_ref[o_b1:o_b1 + 1, :kh1], 0.0)                  # (T*NP, K*H1)
    seq = jnp.maximum(mm(h1, w_ref[o_w2:o_w2 + kh1, :kh1])
                      + w_ref[o_b2:o_b2 + 1, :kh1], 0.0)                 # (T*NP, K*H1)

    # ---- Stage 2: LSTM. One fused (i|f|g|o) input projection (+ both biases) hoisted
    # off the recurrence; ONE fused mm(h, W_hh) per step on the serial chain, gates taken
    # as static lane slices of the (NP, 4*H2) block (single lane tile, cheap).
    xp = mm(seq, w_ref[o_wih:o_wih + kh1, :G]) + w_ref[o_br:o_br + 1, :G]  # (T*NP, 4*H2)
    whh = w_ref[o_whh:o_whh + h2, :G]                                      # (H2, 4*H2)

    h = jnp.zeros((np_rows, h2), jnp.float32)
    c = jnp.zeros((np_rows, h2), jnp.float32)
    h_first = h
    for t in range(t_steps):                                             # fully unrolled (T=8)
        g = xp[t * np_rows:(t + 1) * np_rows] + mm(h, whh)               # (NP, 4*H2)
        ig = sigmoid(g[:, 0:h2])
        fg = sigmoid(g[:, h2:2 * h2])
        gg = jnp.tanh(g[:, 2 * h2:3 * h2])
        og = sigmoid(g[:, 3 * h2:4 * h2])
        c = fg * c + ig * gg
        h = og * jnp.tanh(c)
        if t == 0:
            h_first = h

    # ---- Stage 3: development + rotation, fully fused.
    # fc2_1 is affine and the so(2) increments telescope (hidden_size=2 SO(2) commutes), so
    # the ordered product of per-step rotations is one rotation by
    #   phi = (h_T - h_1) @ (w21 @ theta)        (fc2_1 bias cancels exactly).
    # w21 @ theta is pre-fused and duplicated to width 2K at pack time; the rotation is
    # applied as cos(phi)*[x|y] + sin(phi)*[-y|x] with [x|y|-y|x] prepared in the wrapper,
    # so the kernel needs no lane concat and does one dense (NP, 2K) store.
    phi2 = mm(h - h_first, w_ref[o_wt:o_wt + h2, :2 * k_atoms])          # (NP, 2K) = [phi|phi]
    v = inp_ref[...]                                                     # (NP, 4K) = [x|y|-y|x]
    out_ref[...] = (jnp.cos(phi2) * v[:, :2 * k_atoms]
                    + jnp.sin(phi2) * v[:, 2 * k_atoms:])                # (NP, 2K) = [x'|y']


# ---------------- One-time parameter packing (hoisted out of the per-call path) ----------------

def pack_params(params, *, n_atoms):
    """Fold/pack all weights into a single VMEM slab. Run ONCE at param-load time."""
    f32 = jnp.float32
    K = n_atoms
    C, H1 = params['w11'].shape
    H2 = params['w_hh'].shape[0]

    eyeK = jnp.eye(K, dtype=f32)
    w1bd = jnp.kron(eyeK, params['w11'].astype(f32))                # (K*C, K*H1) block-diag
    b1bd = jnp.tile(params['b11'].astype(f32), (1, K))              # (1, K*H1)
    w2bd = jnp.kron(eyeK, params['w12'].astype(f32))                # (K*H1, K*H1)
    b2bd = jnp.tile(params['b12'].astype(f32), (1, K))              # (1, K*H1)
    wih = params['w_ih'].astype(f32)                                # (K*H1, 4*H2) gates i|f|g|o
    whh = params['w_hh'].astype(f32)                                # (H2, 4*H2)
    br = (params['b_ih'] + params['b_hh']).astype(f32)              # (1, 4*H2) fused biases
    w21th = (params['w21'] @ params['theta']).astype(f32)           # (H2, K) fused fc2_1 . theta
    w21th2 = jnp.concatenate([w21th, w21th], axis=1)                # (H2, 2K)

    segs = [w1bd, b1bd, w2bd, b2bd, wih, whh, br, w21th2]
    lanes = max(s.shape[1] for s in segs)
    offs, rows = [], 0
    for s in segs:
        offs.append(rows)
        rows += ((s.shape[0] + 7) // 8) * 8        # keep every segment 8-sublane aligned
    slab = jnp.zeros((rows, lanes), f32)
    for off, s in zip(offs, segs):
        slab = slab.at[off:off + s.shape[0], :s.shape[1]].set(s)

    meta = dict(K=K, C=C, H1=H1, H2=H2, offs=tuple(offs))
    return slab, meta


# ---------------- Forward wrapper (the only per-call code besides the kernel) ----------------

def _full_spec(shape):
    return pl.BlockSpec(shape, lambda *_: (0,) * len(shape))


def lstm_dev_so_forward(X, wslab, *, meta):
    N, T, K, C = X.shape
    assert K == meta['K'] and C == meta['C']
    H1, H2 = meta['H1'], meta['H2']
    NP = max(8, ((N + 7) // 8) * 8)                 # pad batch rows to full sublane groups
    f32 = jnp.float32

    # Tiny per-call layout prep on the raw 2.5 KB input; every large intermediate stays
    # VMEM-resident inside the single pallas_call.
    xt = jnp.transpose(X, (1, 0, 2, 3)).reshape(T, N, K * C).astype(f32)   # time-major
    xt = jnp.pad(xt, ((0, 0), (0, NP - N), (0, 0)))
    xseq = xt.reshape(T * NP, K * C)

    last = X[:, -1, :, :2].astype(f32)                                     # (N, K, 2)
    x_, y_ = last[..., 0], last[..., 1]
    inp = jnp.concatenate([x_, y_, -y_, x_], axis=1)                       # (N, 4K) = [x|y|-y|x]
    inp = jnp.pad(inp, ((0, NP - N), (0, 0)))

    kernel = functools.partial(
        _fused_kernel, t_steps=T, np_rows=NP, k_atoms=K,
        kc=K * C, kh1=K * H1, h2=H2, offs=meta['offs'])

    res = pl.pallas_call(
        kernel,
        out_shape=jax.ShapeDtypeStruct((NP, 2 * K), f32),
        grid=(1,),
        in_specs=[_full_spec(xseq.shape), _full_spec(inp.shape), _full_spec(wslab.shape)],
        out_specs=_full_spec((NP, 2 * K)),
        compiler_params=pltpu.CompilerParams(dimension_semantics=("arbitrary",)),
    )(xseq, inp, wslab)

    # (NP, 2K) = [x' | y'] -> (N, K, 2)
    return res[:N].reshape(N, 2, K).transpose(0, 2, 1)


# ---------------- Pure-JAX reference for validation ----------------

def reference_forward(X, p):
    N, T, K, C = X.shape
    H2 = p['w_hh'].shape[0]
    inp = X[:, -1, :, :2]                                           # (N, K, 2)

    h = jax.nn.relu(X @ p['w11'] + p['b11'][0])
    h = jax.nn.relu(h @ p['w12'] + p['b12'][0])
    seq = h.reshape(N, T, -1)

    hs = jnp.zeros((N, H2), jnp.float32)
    cs = jnp.zeros((N, H2), jnp.float32)
    ys = []
    for t in range(T):                                              # torch LSTM, gates i,f,g,o
        g = (seq[:, t] @ p['w_ih'] + p['b_ih'][0]
             + hs @ p['w_hh'] + p['b_hh'][0])
        ig = jax.nn.sigmoid(g[:, 0:H2])
        fg = jax.nn.sigmoid(g[:, H2:2 * H2])
        gg = jnp.tanh(g[:, 2 * H2:3 * H2])
        og = jax.nn.sigmoid(g[:, 3 * H2:4 * H2])
        cs = fg * cs + ig * gg
        hs = og * jnp.tanh(cs)
        ys.append(hs @ p['w21'] + p['b21'][0])                      # fc2_1 on full sequence
    Y = jnp.stack(ys, axis=1)                                       # (N, T, dev_input)

    # development_layer: literal ordered product of per-increment SO(2) matrices.
    dY = Y[:, 1:] - Y[:, :-1]                                       # (N, T-1, dev_input)
    ang = jnp.einsum('ntd,dk->ntk', dY, p['theta'])                 # (N, T-1, K)
    c_, s_ = jnp.cos(ang), jnp.sin(ang)
    M = jnp.stack([jnp.stack([c_, -s_], -1), jnp.stack([s_, c_], -1)], -2)   # (N,T-1,K,2,2)
    Z = jnp.broadcast_to(jnp.eye(2, dtype=jnp.float32), (N, K, 2, 2))
    for t in range(T - 1):
        Z = jnp.einsum('nkij,nkjl->nkil', Z, M[:, t])
    out = jnp.einsum('nkij,nkj->nki', Z, inp)                       # (N, K, 2)
    return out


if __name__ == "__main__":
    # Module hyperparameters (defaults of the PyTorch module; n_out unused in forward).
    n_inputs, n_atoms, n_hid1, n_hid2, dev_input = 4, 5, 10, 20, 8
    N, T, K, C = 2, 8, n_atoms, n_inputs

    key = jax.random.PRNGKey(0)
    keys = jax.random.split(key, 12)

    def init(k, shape, scale=0.1):
        return (scale * jax.random.normal(k, shape)).astype(jnp.float32)

    params = {
        'w11': init(keys[0], (C, n_hid1)),
        'b11': init(keys[1], (1, n_hid1)),
        'w12': init(keys[2], (n_hid1, n_hid1)),
        'b12': init(keys[3], (1, n_hid1)),
        'w_ih': init(keys[4], (K * n_hid1, 4 * n_hid2)),   # torch LSTM weights, pre-transposed
        'w_hh': init(keys[5], (n_hid2, 4 * n_hid2)),
        'b_ih': init(keys[6], (1, 4 * n_hid2)),
        'b_hh': init(keys[7], (1, 4 * n_hid2)),
        'w21': init(keys[8], (n_hid2, dev_input)),
        'b21': init(keys[9], (1, dev_input)),
        'theta': init(keys[10], (dev_input, K), scale=0.5),  # so(2) angle scale per (feature, atom)
    }
    X = jax.random.normal(keys[11], (N, T, K, C), dtype=jnp.float32)

    wslab, meta = pack_params(params, n_atoms=n_atoms)       # one-time, outside the per-call path
    fwd = jax.jit(functools.partial(lstm_dev_so_forward, meta=meta))
    out = jax.block_until_ready(fwd(X, wslab))
    ref = reference_forward(X, params)

    assert out.shape == (N, K, 2), out.shape
    assert jnp.allclose(out, ref, atol=1e-3, rtol=1e-3), "mismatch vs pure-JAX reference"
    print("KERNEL_OK")
</pallas_src>

<mosaic_0001>
module attributes {stable_mosaic.version = 11 : i64} {
  func.func @_fused_kernel(%arg0: i32, %arg1: memref<64x20xf32, #tpu.memory_space<vmem>>, %arg2: memref<8x20xf32, #tpu.memory_space<vmem>>, %arg3: memref<208x80xf32, #tpu.memory_space<vmem>>, %arg4: memref<8x10xf32, #tpu.memory_space<vmem>>) attributes {dimension_semantics = [#tpu.dimension_semantics<arbitrary>], iteration_bounds = array<i64: 1>, scalar_prefetch = 0 : i64, scratch_operands = 0 : i64, tpu.core_type = #tpu.core_type<tc>, window_params = [{pipeline_mode = #tpu.pipeline_mode<synchronous>, transform_indices = @transform_0, window_bounds = array<i64: 64, 20>}, {pipeline_mode = #tpu.pipeline_mode<synchronous>, transform_indices = @transform_1, window_bounds = array<i64: 8, 20>}, {pipeline_mode = #tpu.pipeline_mode<synchronous>, transform_indices = @transform_2, window_bounds = array<i64: 208, 80>}, {pipeline_mode = #tpu.pipeline_mode<synchronous>, transform_indices = @transform_3, window_bounds = array<i64: 8, 10>}]} {
    %c0 = arith.constant 0 : index
    %c0_0 = arith.constant 0 : index
    %0 = vector.load %arg1[%c0, %c0_0] : memref<64x20xf32, #tpu.memory_space<vmem>>, vector<64x20xf32>
    %c0_1 = arith.constant 0 : index
    %c0_2 = arith.constant 0 : index
    %1 = vector.load %arg3[%c0_1, %c0_2] : memref<208x80xf32, #tpu.memory_space<vmem>>, vector<20x50xf32>
    %cst = arith.constant dense<0.000000e+00> : vector<64x50xf32>
    %2 = tpu.matmul %0, %1, %cst {dimension_numbers = #tpu.dot_dimension_numbers<[1], [0], [0], [1], [0, 0, 1, 1], [], []>} : vector<64x20xf32>, vector<20x50xf32>, vector<64x50xf32> -> vector<64x50xf32>
    %c24 = arith.constant 24 : index
    %c0_3 = arith.constant 0 : index
    %3 = vector.load %arg3[%c24, %c0_3] : memref<208x80xf32, #tpu.memory_space<vmem>>, vector<1x50xf32>
    %4 = vector.broadcast %3 : vector<1x50xf32> to vector<64x50xf32>
    %5 = arith.addf %2, %4 : vector<64x50xf32>
    %cst_4 = arith.constant 0.000000e+00 : f32
    %6 = vector.broadcast %cst_4 : f32 to vector<64x50xf32>
    %7 = arith.maximumf %5, %6 : vector<64x50xf32>
    %c32 = arith.constant 32 : index
    %c0_5 = arith.constant 0 : index
    %8 = vector.load %arg3[%c32, %c0_5] : memref<208x80xf32, #tpu.memory_space<vmem>>, vector<50x50xf32>
    %cst_6 = arith.constant dense<0.000000e+00> : vector<64x50xf32>
    %9 = tpu.matmul %7, %8, %cst_6 {dimension_numbers = #tpu.dot_dimension_numbers<[1], [0], [0], [1], [0, 0, 1, 1], [], []>} : vector<64x50xf32>, vector<50x50xf32>, vector<64x50xf32> -> vector<64x50xf32>
    %c88 = arith.constant 88 : index
    %c0_7 = arith.constant 0 : index
    %10 = vector.load %arg3[%c88, %c0_7] : memref<208x80xf32, #tpu.memory_space<vmem>>, vector<1x50xf32>
    %11 = vector.broadcast %10 : vector<1x50xf32> to vector<64x50xf32>
    %12 = arith.addf %9, %11 : vector<64x50xf32>
    %cst_8 = arith.constant 0.000000e+00 : f32
    %13 = vector.broadcast %cst_8 : f32 to vector<64x50xf32>
    %14 = arith.maximumf %12, %13 : vector<64x50xf32>
    %c96 = arith.constant 96 : index
    %c0_9 = arith.constant 0 : index
    %15 = vector.load %arg3[%c96, %c0_9] : memref<208x80xf32, #tpu.memory_space<vmem>>, vector<50x80xf32>
    %cst_10 = arith.constant dense<0.000000e+00> : vector<64x80xf32>
    %16 = tpu.matmul %14, %15, %cst_10 {dimension_numbers = #tpu.dot_dimension_numbers<[1], [0], [0], [1], [0, 0, 1, 1], [], []>} : vector<64x50xf32>, vector<50x80xf32>, vector<64x80xf32> -> vector<64x80xf32>
    %c176 = arith.constant 176 : index
    %c0_11 = arith.constant 0 : index
    %17 = vector.load %arg3[%c176, %c0_11] : memref<208x80xf32, #tpu.memory_space<vmem>>, vector<1x80xf32>
    %18 = vector.broadcast %17 : vector<1x80xf32> to vector<64x80xf32>
    %19 = arith.addf %16, %18 : vector<64x80xf32>
    %c152 = arith.constant 152 : index
    %c0_12 = arith.constant 0 : index
    %20 = vector.load %arg3[%c152, %c0_12] : memref<208x80xf32, #tpu.memory_space<vmem>>, vector<20x80xf32>
    %cst_13 = arith.constant 0.000000e+00 : f32
    %21 = vector.broadcast %cst_13 : f32 to vector<8x20xf32>
    %cst_14 = arith.constant 0.000000e+00 : f32
    %22 = vector.broadcast %cst_14 : f32 to vector<8x20xf32>
    %23 = vector.extract_strided_slice %19 {offsets = [0, 0], sizes = [8, 80], strides = [1, 1]} : vector<64x80xf32> to vector<8x80xf32>
    %cst_15 = arith.constant dense<0.000000e+00> : vector<8x80xf32>
    %24 = tpu.matmul %21, %20, %cst_15 {dimension_numbers = #tpu.dot_dimension_numbers<[1], [0], [0], [1], [0, 0, 1, 1], [], []>} : vector<8x20xf32>, vector<20x80xf32>, vector<8x80xf32> -> vector<8x80xf32>
    %25 = arith.addf %23, %24 : vector<8x80xf32>
    %26 = vector.extract_strided_slice %25 {offsets = [0, 0], sizes = [8, 20], strides = [1, 1]} : vector<8x80xf32> to vector<8x20xf32>
    %cst_16 = arith.constant 5.000000e-01 : f32
    %27 = vector.broadcast %cst_16 : f32 to vector<8x20xf32>
    %28 = arith.mulf %27, %26 : vector<8x20xf32>
    %29 = math.tanh %28 : vector<8x20xf32>
    %cst_17 = arith.constant 1.000000e+00 : f32
    %30 = vector.broadcast %cst_17 : f32 to vector<8x20xf32>
    %31 = arith.addf %29, %30 : vector<8x20xf32>
    %cst_18 = arith.constant 5.000000e-01 : f32
    %32 = vector.broadcast %cst_18 : f32 to vector<8x20xf32>
    %33 = arith.mulf %32, %31 : vector<8x20xf32>
    %34 = vector.extract_strided_slice %25 {offsets = [0, 20], sizes = [8, 20], strides = [1, 1]} : vector<8x80xf32> to vector<8x20xf32>
    %cst_19 = arith.constant 5.000000e-01 : f32
    %35 = vector.broadcast %cst_19 : f32 to vector<8x20xf32>
    %36 = arith.mulf %35, %34 : vector<8x20xf32>
    %37 = math.tanh %36 : vector<8x20xf32>
    %cst_20 = arith.constant 1.000000e+00 : f32
    %38 = vector.broadcast %cst_20 : f32 to vector<8x20xf32>
    %39 = arith.addf %37, %38 : vector<8x20xf32>
    %cst_21 = arith.constant 5.000000e-01 : f32
    %40 = vector.broadcast %cst_21 : f32 to vector<8x20xf32>
    %41 = arith.mulf %40, %39 : vector<8x20xf32>
    %42 = vector.extract_strided_slice %25 {offsets = [0, 40], sizes = [8, 20], strides = [1, 1]} : vector<8x80xf32> to vector<8x20xf32>
    %43 = math.tanh %42 : vector<8x20xf32>
    %44 = vector.extract_strided_slice %25 {offsets = [0, 60], sizes = [8, 20], strides = [1, 1]} : vector<8x80xf32> to vector<8x20xf32>
    %cst_22 = arith.constant 5.000000e-01 : f32
    %45 = vector.broadcast %cst_22 : f32 to vector<8x20xf32>
    %46 = arith.mulf %45, %44 : vector<8x20xf32>
    %47 = math.tanh %46 : vector<8x20xf32>
    %cst_23 = arith.constant 1.000000e+00 : f32
    %48 = vector.broadcast %cst_23 : f32 to vector<8x20xf32>
    %49 = arith.addf %47, %48 : vector<8x20xf32>
    %cst_24 = arith.constant 5.000000e-01 : f32
    %50 = vector.broadcast %cst_24 : f32 to vector<8x20xf32>
    %51 = arith.mulf %50, %49 : vector<8x20xf32>
    %52 = arith.mulf %41, %22 : vector<8x20xf32>
    %53 = arith.mulf %33, %43 : vector<8x20xf32>
    %54 = arith.addf %52, %53 : vector<8x20xf32>
    %55 = math.tanh %54 : vector<8x20xf32>
    %56 = arith.mulf %51, %55 : vector<8x20xf32>
    %57 = vector.extract_strided_slice %19 {offsets = [8, 0], sizes = [8, 80], strides = [1, 1]} : vector<64x80xf32> to vector<8x80xf32>
    %cst_25 = arith.constant dense<0.000000e+00> : vector<8x80xf32>
    %58 = tpu.matmul %56, %20, %cst_25 {dimension_numbers = #tpu.dot_dimension_numbers<[1], [0], [0], [1], [0, 0, 1, 1], [], []>} : vector<8x20xf32>, vector<20x80xf32>, vector<8x80xf32> -> vector<8x80xf32>
    %59 = arith.addf %57, %58 : vector<8x80xf32>
    %60 = vector.extract_strided_slice %59 {offsets = [0, 0], sizes = [8, 20], strides = [1, 1]} : vector<8x80xf32> to vector<8x20xf32>
    %cst_26 = arith.constant 5.000000e-01 : f32
    %61 = vector.broadcast %cst_26 : f32 to vector<8x20xf32>
    %62 = arith.mulf %61, %60 : vector<8x20xf32>
    %63 = math.tanh %62 : vector<8x20xf32>
    %cst_27 = arith.constant 1.000000e+00 : f32
    %64 = vector.broadcast %cst_27 : f32 to vector<8x20xf32>
    %65 = arith.addf %63, %64 : vector<8x20xf32>
    %cst_28 = arith.constant 5.000000e-01 : f32
    %66 = vector.broadcast %cst_28 : f32 to vector<8x20xf32>
    %67 = arith.mulf %66, %65 : vector<8x20xf32>
    %68 = vector.extract_strided_slice %59 {offsets = [0, 20], sizes = [8, 20], strides = [1, 1]} : vector<8x80xf32> to vector<8x20xf32>
    %cst_29 = arith.constant 5.000000e-01 : f32
    %69 = vector.broadcast %cst_29 : f32 to vector<8x20xf32>
    %70 = arith.mulf %69, %68 : vector<8x20xf32>
    %71 = math.tanh %70 : vector<8x20xf32>
    %cst_30 = arith.constant 1.000000e+00 : f32
    %72 = vector.broadcast %cst_30 : f32 to vector<8x20xf32>
    %73 = arith.addf %71, %72 : vector<8x20xf32>
    %cst_31 = arith.constant 5.000000e-01 : f32
    %74 = vector.broadcast %cst_31 : f32 to vector<8x20xf32>
    %75 = arith.mulf %74, %73 : vector<8x20xf32>
    %76 = vector.extract_strided_slice %59 {offsets = [0, 40], sizes = [8, 20], strides = [1, 1]} : vector<8x80xf32> to vector<8x20xf32>
    %77 = math.tanh %76 : vector<8x20xf32>
    %78 = vector.extract_strided_slice %59 {offsets = [0, 60], sizes = [8, 20], strides = [1, 1]} : vector<8x80xf32> to vector<8x20xf32>
    %cst_32 = arith.constant 5.000000e-01 : f32
    %79 = vector.broadcast %cst_32 : f32 to vector<8x20xf32>
    %80 = arith.mulf %79, %78 : vector<8x20xf32>
    %81 = math.tanh %80 : vector<8x20xf32>
    %cst_33 = arith.constant 1.000000e+00 : f32
    %82 = vector.broadcast %cst_33 : f32 to vector<8x20xf32>
    %83 = arith.addf %81, %82 : vector<8x20xf32>
    %cst_34 = arith.constant 5.000000e-01 : f32
    %84 = vector.broadcast %cst_34 : f32 to vector<8x20xf32>
    %85 = arith.mulf %84, %83 : vector<8x20xf32>
    %86 = arith.mulf %75, %54 : vector<8x20xf32>
    %87 = arith.mulf %67, %77 : vector<8x20xf32>
    %88 = arith.addf %86, %87 : vector<8x20xf32>
    %89 = math.tanh %88 : vector<8x20xf32>
    %90 = arith.mulf %85, %89 : vector<8x20xf32>
    %91 = vector.extract_strided_slice %19 {offsets = [16, 0], sizes = [8, 80], strides = [1, 1]} : vector<64x80xf32> to vector<8x80xf32>
    %cst_35 = arith.constant dense<0.000000e+00> : vector<8x80xf32>
    %92 = tpu.matmul %90, %20, %cst_35 {dimension_numbers = #tpu.dot_dimension_numbers<[1], [0], [0], [1], [0, 0, 1, 1], [], []>} : vector<8x20xf32>, vector<20x80xf32>, vector<8x80xf32> -> vector<8x80xf32>
    %93 = arith.addf %91, %92 : vector<8x80xf32>
    %94 = vector.extract_strided_slice %93 {offsets = [0, 0], sizes = [8, 20], strides = [1, 1]} : vector<8x80xf32> to vector<8x20xf32>
    %cst_36 = arith.constant 5.000000e-01 : f32
    %95 = vector.broadcast %cst_36 : f32 to vector<8x20xf32>
    %96 = arith.mulf %95, %94 : vector<8x20xf32>
    %97 = math.tanh %96 : vector<8x20xf32>
    %cst_37 = arith.constant 1.000000e+00 : f32
    %98 = vector.broadcast %cst_37 : f32 to vector<8x20xf32>
    %99 = arith.addf %97, %98 : vector<8x20xf32>
    %cst_38 = arith.constant 5.000000e-01 : f32
    %100 = vector.broadcast %cst_38 : f32 to vector<8x20xf32>
    %101 = arith.mulf %100, %99 : vector<8x20xf32>
    %102 = vector.extract_strided_slice %93 {offsets = [0, 20], sizes = [8, 20], strides = [1, 1]} : vector<8x80xf32> to vector<8x20xf32>
    %cst_39 = arith.constant 5.000000e-01 : f32
    %103 = vector.broadcast %cst_39 : f32 to vector<8x20xf32>
    %104 = arith.mulf %103, %102 : vector<8x20xf32>
    %105 = math.tanh %104 : vector<8x20xf32>
    %cst_40 = arith.constant 1.000000e+00 : f32
    %106 = vector.broadcast %cst_40 : f32 to vector<8x20xf32>
    %107 = arith.addf %105, %106 : vector<8x20xf32>
    %cst_41 = arith.constant 5.000000e-01 : f32
    %108 = vector.broadcast %cst_41 : f32 to vector<8x20xf32>
    %109 = arith.mulf %108, %107 : vector<8x20xf32>
    %110 = vector.extract_strided_slice %93 {offsets = [0, 40], sizes = [8, 20], strides = [1, 1]} : vector<8x80xf32> to vector<8x20xf32>
    %111 = math.tanh %110 : vector<8x20xf32>
    %112 = vector.extract_strided_slice %93 {offsets = [0, 60], sizes = [8, 20], strides = [1, 1]} : vector<8x80xf32> to vector<8x20xf32>
    %cst_42 = arith.constant 5.000000e-01 : f32
    %113 = vector.broadcast %cst_42 : f32 to vector<8x20xf32>
    %114 = arith.mulf %113, %112 : vector<8x20xf32>
    %115 = math.tanh %114 : vector<8x20xf32>
    %cst_43 = arith.constant 1.000000e+00 : f32
    %116 = vector.broadcast %cst_43 : f32 to vector<8x20xf32>
    %117 = arith.addf %115, %116 : vector<8x20xf32>
    %cst_44 = arith.constant 5.000000e-01 : f32
    %118 = vector.broadcast %cst_44 : f32 to vector<8x20xf32>
    %119 = arith.mulf %118, %117 : vector<8x20xf32>
    %120 = arith.mulf %109, %88 : vector<8x20xf32>
    %121 = arith.mulf %101, %111 : vector<8x20xf32>
    %122 = arith.addf %120, %121 : vector<8x20xf32>
    %123 = math.tanh %122 : vector<8x20xf32>
    %124 = arith.mulf %119, %123 : vector<8x20xf32>
    %125 = vector.extract_strided_slice %19 {offsets = [24, 0], sizes = [8, 80], strides = [1, 1]} : vector<64x80xf32> to vector<8x80xf32>
    %cst_45 = arith.constant dense<0.000000e+00> : vector<8x80xf32>
    %126 = tpu.matmul %124, %20, %cst_45 {dimension_numbers = #tpu.dot_dimension_numbers<[1], [0], [0], [1], [0, 0, 1, 1], [], []>} : vector<8x20xf32>, vector<20x80xf32>, vector<8x80xf32> -> vector<8x80xf32>
    %127 = arith.addf %125, %126 : vector<8x80xf32>
    %128 = vector.extract_strided_slice %127 {offsets = [0, 0], sizes = [8, 20], strides = [1, 1]} : vector<8x80xf32> to vector<8x20xf32>
    %cst_46 = arith.constant 5.000000e-01 : f32
    %129 = vector.broadcast %cst_46 : f32 to vector<8x20xf32>
    %130 = arith.mulf %129, %128 : vector<8x20xf32>
    %131 = math.tanh %130 : vector<8x20xf32>
    %cst_47 = arith.constant 1.000000e+00 : f32
    %132 = vector.broadcast %cst_47 : f32 to vector<8x20xf32>
    %133 = arith.addf %131, %132 : vector<8x20xf32>
    %cst_48 = arith.constant 5.000000e-01 : f32
    %134 = vector.broadcast %cst_48 : f32 to vector<8x20xf32>
    %135 = arith.mulf %134, %133 : vector<8x20xf32>
    %136 = vector.extract_strided_slice %127 {offsets = [0, 20], sizes = [8, 20], strides = [1, 1]} : vector<8x80xf32> to vector<8x20xf32>
    %cst_49 = arith.constant 5.000000e-01 : f32
    %137 = vector.broadcast %cst_49 : f32 to vector<8x20xf32>
    %138 = arith.mulf %137, %136 : vector<8x20xf32>
    %139 = math.tanh %138 : vector<8x20xf32>
    %cst_50 = arith.constant 1.000000e+00 : f32
    %140 = vector.broadcast %cst_50 : f32 to vector<8x20xf32>
    %141 = arith.addf %139, %140 : vector<8x20xf32>
    %cst_51 = arith.constant 5.000000e-01 : f32
    %142 = vector.broadcast %cst_51 : f32 to vector<8x20xf32>
    %143 = arith.mulf %142, %141 : vector<8x20xf32>
    %144 = vector.extract_strided_slice %127 {offsets = [0, 40], sizes = [8, 20], strides = [1, 1]} : vector<8x80xf32> to vector<8x20xf32>
    %145 = math.tanh %144 : vector<8x20xf32>
    %146 = vector.extract_strided_slice %127 {offsets = [0, 60], sizes = [8, 20], strides = [1, 1]} : vector<8x80xf32> to vector<8x20xf32>
    %cst_52 = arith.constant 5.000000e-01 : f32
    %147 = vector.broadcast %cst_52 : f32 to vector<8x20xf32>
    %148 = arith.mulf %147, %146 : vector<8x20xf32>
    %149 = math.tanh %148 : vector<8x20xf32>
    %cst_53 = arith.constant 1.000000e+00 : f32
    %150 = vector.broadcast %cst_53 : f32 to vector<8x20xf32>
    %151 = arith.addf %149, %150 : vector<8x20xf32>
    %cst_54 = arith.constant 5.000000e-01 : f32
    %152 = vector.broadcast %cst_54 : f32 to vector<8x20xf32>
    %153 = arith.mulf %152, %151 : vector<8x20xf32>
    %154 = arith.mulf %143, %122 : vector<8x20xf32>
    %155 = arith.mulf %135, %145 : vector<8x20xf32>
    %156 = arith.addf %154, %155 : vector<8x20xf32>
    %157 = math.tanh %156 : vector<8x20xf32>
    %158 = arith.mulf %153, %157 : vector<8x20xf32>
    %159 = vector.extract_strided_slice %19 {offsets = [32, 0], sizes = [8, 80], strides = [1, 1]} : vector<64x80xf32> to vector<8x80xf32>
    %cst_55 = arith.constant dense<0.000000e+00> : vector<8x80xf32>
    %160 = tpu.matmul %158, %20, %cst_55 {dimension_numbers = #tpu.dot_dimension_numbers<[1], [0], [0], [1], [0, 0, 1, 1], [], []>} : vector<8x20xf32>, vector<20x80xf32>, vector<8x80xf32> -> vector<8x80xf32>
    %161 = arith.addf %159, %160 : vector<8x80xf32>
    %162 = vector.extract_strided_slice %161 {offsets = [0, 0], sizes = [8, 20], strides = [1, 1]} : vector<8x80xf32> to vector<8x20xf32>
    %cst_56 = arith.constant 5.000000e-01 : f32
    %163 = vector.broadcast %cst_56 : f32 to vector<8x20xf32>
    %164 = arith.mulf %163, %162 : vector<8x20xf32>
    %165 = math.tanh %164 : vector<8x20xf32>
    %cst_57 = arith.constant 1.000000e+00 : f32
    %166 = vector.broadcast %cst_57 : f32 to vector<8x20xf32>
    %167 = arith.addf %165, %166 : vector<8x20xf32>
    %cst_58 = arith.constant 5.000000e-01 : f32
    %168 = vector.broadcast %cst_58 : f32 to vector<8x20xf32>
    %169 = arith.mulf %168, %167 : vector<8x20xf32>
    %170 = vector.extract_strided_slice %161 {offsets = [0, 20], sizes = [8, 20], strides = [1, 1]} : vector<8x80xf32> to vector<8x20xf32>
    %cst_59 = arith.constant 5.000000e-01 : f32
    %171 = vector.broadcast %cst_59 : f32 to vector<8x20xf32>
    %172 = arith.mulf %171, %170 : vector<8x20xf32>
    %173 = math.tanh %172 : vector<8x20xf32>
    %cst_60 = arith.constant 1.000000e+00 : f32
    %174 = vector.broadcast %cst_60 : f32 to vector<8x20xf32>
    %175 = arith.addf %173, %174 : vector<8x20xf32>
    %cst_61 = arith.constant 5.000000e-01 : f32
    %176 = vector.broadcast %cst_61 : f32 to vector<8x20xf32>
    %177 = arith.mulf %176, %175 : vector<8x20xf32>
    %178 = vector.extract_strided_slice %161 {offsets = [0, 40], sizes = [8, 20], strides = [1, 1]} : vector<8x80xf32> to vector<8x20xf32>
    %179 = math.tanh %178 : vector<8x20xf32>
    %180 = vector.extract_strided_slice %161 {offsets = [0, 60], sizes = [8, 20], strides = [1, 1]} : vector<8x80xf32> to vector<8x20xf32>
    %cst_62 = arith.constant 5.000000e-01 : f32
    %181 = vector.broadcast %cst_62 : f32 to vector<8x20xf32>
    %182 = arith.mulf %181, %180 : vector<8x20xf32>
    %183 = math.tanh %182 : vector<8x20xf32>
    %cst_63 = arith.constant 1.000000e+00 : f32
    %184 = vector.broadcast %cst_63 : f32 to vector<8x20xf32>
    %185 = arith.addf %183, %184 : vector<8x20xf32>
    %cst_64 = arith.constant 5.000000e-01 : f32
    %186 = vector.broadcast %cst_64 : f32 to vector<8x20xf32>
    %187 = arith.mulf %186, %185 : vector<8x20xf32>
    %188 = arith.mulf %177, %156 : vector<8x20xf32>
    %189 = arith.mulf %169, %179 : vector<8x20xf32>
    %190 = arith.addf %188, %189 : vector<8x20xf32>
    %191 = math.tanh %190 : vector<8x20xf32>
    %192 = arith.mulf %187, %191 : vector<8x20xf32>
    %193 = vector.extract_strided_slice %19 {offsets = [40, 0], sizes = [8, 80], strides = [1, 1]} : vector<64x80xf32> to vector<8x80xf32>
    %cst_65 = arith.constant dense<0.000000e+00> : vector<8x80xf32>
    %194 = tpu.matmul %192, %20, %cst_65 {dimension_numbers = #tpu.dot_dimension_numbers<[1], [0], [0], [1], [0, 0, 1, 1], [], []>} : vector<8x20xf32>, vector<20x80xf32>, vector<8x80xf32> -> vector<8x80xf32>
    %195 = arith.addf %193, %194 : vector<8x80xf32>
    %196 = vector.extract_strided_slice %195 {offsets = [0, 0], sizes = [8, 20], strides = [1, 1]} : vector<8x80xf32> to vector<8x20xf32>
    %cst_66 = arith.constant 5.000000e-01 : f32
    %197 = vector.broadcast %cst_66 : f32 to vector<8x20xf32>
    %198 = arith.mulf %197, %196 : vector<8x20xf32>
    %199 = math.tanh %198 : vector<8x20xf32>
    %cst_67 = arith.constant 1.000000e+00 : f32
    %200 = vector.broadcast %cst_67 : f32 to vector<8x20xf32>
    %201 = arith.addf %199, %200 : vector<8x20xf32>
    %cst_68 = arith.constant 5.000000e-01 : f32
    %202 = vector.broadcast %cst_68 : f32 to vector<8x20xf32>
    %203 = arith.mulf %202, %201 : vector<8x20xf32>
    %204 = vector.extract_strided_slice %195 {offsets = [0, 20], sizes = [8, 20], strides = [1, 1]} : vector<8x80xf32> to vector<8x20xf32>
    %cst_69 = arith.constant 5.000000e-01 : f32
    %205 = vector.broadcast %cst_69 : f32 to vector<8x20xf32>
    %206 = arith.mulf %205, %204 : vector<8x20xf32>
    %207 = math.tanh %206 : vector<8x20xf32>
    %cst_70 = arith.constant 1.000000e+00 : f32
    %208 = vector.broadcast %cst_70 : f32 to vector<8x20xf32>
    %209 = arith.addf %207, %208 : vector<8x20xf32>
    %cst_71 = arith.constant 5.000000e-01 : f32
    %210 = vector.broadcast %cst_71 : f32 to vector<8x20xf32>
    %211 = arith.mulf %210, %209 : vector<8x20xf32>
    %212 = vector.extract_strided_slice %195 {offsets = [0, 40], sizes = [8, 20], strides = [1, 1]} : vector<8x80xf32> to vector<8x20xf32>
    %213 = math.tanh %212 : vector<8x20xf32>
    %214 = vector.extract_strided_slice %195 {offsets = [0, 60], sizes = [8, 20], strides = [1, 1]} : vector<8x80xf32> to vector<8x20xf32>
    %cst_72 = arith.constant 5.000000e-01 : f32
    %215 = vector.broadcast %cst_72 : f32 to vector<8x20xf32>
    %216 = arith.mulf %215, %214 : vector<8x20xf32>
    %217 = math.tanh %216 : vector<8x20xf32>
    %cst_73 = arith.constant 1.000000e+00 : f32
    %218 = vector.broadcast %cst_73 : f32 to vector<8x20xf32>
    %219 = arith.addf %217, %218 : vector<8x20xf32>
    %cst_74 = arith.constant 5.000000e-01 : f32
    %220 = vector.broadcast %cst_74 : f32 to vector<8x20xf32>
    %221 = arith.mulf %220, %219 : vector<8x20xf32>
    %222 = arith.mulf %211, %190 : vector<8x20xf32>
    %223 = arith.mulf %203, %213 : vector<8x20xf32>
    %224 = arith.addf %222, %223 : vector<8x20xf32>
    %225 = math.tanh %224 : vector<8x20xf32>
    %226 = arith.mulf %221, %225 : vector<8x20xf32>
    %227 = vector.extract_strided_slice %19 {offsets = [48, 0], sizes = [8, 80], strides = [1, 1]} : vector<64x80xf32> to vector<8x80xf32>
    %cst_75 = arith.constant dense<0.000000e+00> : vector<8x80xf32>
    %228 = tpu.matmul %226, %20, %cst_75 {dimension_numbers = #tpu.dot_dimension_numbers<[1], [0], [0], [1], [0, 0, 1, 1], [], []>} : vector<8x20xf32>, vector<20x80xf32>, vector<8x80xf32> -> vector<8x80xf32>
    %229 = arith.addf %227, %228 : vector<8x80xf32>
    %230 = vector.extract_strided_slice %229 {offsets = [0, 0], sizes = [8, 20], strides = [1, 1]} : vector<8x80xf32> to vector<8x20xf32>
    %cst_76 = arith.constant 5.000000e-01 : f32
    %231 = vector.broadcast %cst_76 : f32 to vector<8x20xf32>
    %232 = arith.mulf %231, %230 : vector<8x20xf32>
    %233 = math.tanh %232 : vector<8x20xf32>
    %cst_77 = arith.constant 1.000000e+00 : f32
    %234 = vector.broadcast %cst_77 : f32 to vector<8x20xf32>
    %235 = arith.addf %233, %234 : vector<8x20xf32>
    %cst_78 = arith.constant 5.000000e-01 : f32
    %236 = vector.broadcast %cst_78 : f32 to vector<8x20xf32>
    %237 = arith.mulf %236, %235 : vector<8x20xf32>
    %238 = vector.extract_strided_slice %229 {offsets = [0, 20], sizes = [8, 20], strides = [1, 1]} : vector<8x80xf32> to vector<8x20xf32>
    %cst_79 = arith.constant 5.000000e-01 : f32
    %239 = vector.broadcast %cst_79 : f32 to vector<8x20xf32>
    %240 = arith.mulf %239, %238 : vector<8x20xf32>
    %241 = math.tanh %240 : vector<8x20xf32>
    %cst_80 = arith.constant 1.000000e+00 : f32
    %242 = vector.broadcast %cst_80 : f32 to vector<8x20xf32>
    %243 = arith.addf %241, %242 : vector<8x20xf32>
    %cst_81 = arith.constant 5.000000e-01 : f32
    %244 = vector.broadcast %cst_81 : f32 to vector<8x20xf32>
    %245 = arith.mulf %244, %243 : vector<8x20xf32>
    %246 = vector.extract_strided_slice %229 {offsets = [0, 40], sizes = [8, 20], strides = [1, 1]} : vector<8x80xf32> to vector<8x20xf32>
    %247 = math.tanh %246 : vector<8x20xf32>
    %248 = vector.extract_strided_slice %229 {offsets = [0, 60], sizes = [8, 20], strides = [1, 1]} : vector<8x80xf32> to vector<8x20xf32>
    %cst_82 = arith.constant 5.000000e-01 : f32
    %249 = vector.broadcast %cst_82 : f32 to vector<8x20xf32>
    %250 = arith.mulf %249, %248 : vector<8x20xf32>
    %251 = math.tanh %250 : vector<8x20xf32>
    %cst_83 = arith.constant 1.000000e+00 : f32
    %252 = vector.broadcast %cst_83 : f32 to vector<8x20xf32>
    %253 = arith.addf %251, %252 : vector<8x20xf32>
    %cst_84 = arith.constant 5.000000e-01 : f32
    %254 = vector.broadcast %cst_84 : f32 to vector<8x20xf32>
    %255 = arith.mulf %254, %253 : vector<8x20xf32>
    %256 = arith.mulf %245, %224 : vector<8x20xf32>
    %257 = arith.mulf %237, %247 : vector<8x20xf32>
    %258 = arith.addf %256, %257 : vector<8x20xf32>
    %259 = math.tanh %258 : vector<8x20xf32>
    %260 = arith.mulf %255, %259 : vector<8x20xf32>
    %261 = vector.extract_strided_slice %19 {offsets = [56, 0], sizes = [8, 80], strides = [1, 1]} : vector<64x80xf32> to vector<8x80xf32>
    %cst_85 = arith.constant dense<0.000000e+00> : vector<8x80xf32>
    %262 = tpu.matmul %260, %20, %cst_85 {dimension_numbers = #tpu.dot_dimension_numbers<[1], [0], [0], [1], [0, 0, 1, 1], [], []>} : vector<8x20xf32>, vector<20x80xf32>, vector<8x80xf32> -> vector<8x80xf32>
    %263 = arith.addf %261, %262 : vector<8x80xf32>
    %264 = vector.extract_strided_slice %263 {offsets = [0, 0], sizes = [8, 20], strides = [1, 1]} : vector<8x80xf32> to vector<8x20xf32>
    %cst_86 = arith.constant 5.000000e-01 : f32
    %265 = vector.broadcast %cst_86 : f32 to vector<8x20xf32>
    %266 = arith.mulf %265, %264 : vector<8x20xf32>
    %267 = math.tanh %266 : vector<8x20xf32>
    %cst_87 = arith.constant 1.000000e+00 : f32
    %268 = vector.broadcast %cst_87 : f32 to vector<8x20xf32>
    %269 = arith.addf %267, %268 : vector<8x20xf32>
    %cst_88 = arith.constant 5.000000e-01 : f32
    %270 = vector.broadcast %cst_88 : f32 to vector<8x20xf32>
    %271 = arith.mulf %270, %269 : vector<8x20xf32>
    %272 = vector.extract_strided_slice %263 {offsets = [0, 20], sizes = [8, 20], strides = [1, 1]} : vector<8x80xf32> to vector<8x20xf32>
    %cst_89 = arith.constant 5.000000e-01 : f32
    %273 = vector.broadcast %cst_89 : f32 to vector<8x20xf32>
    %274 = arith.mulf %273, %272 : vector<8x20xf32>
    %275 = math.tanh %274 : vector<8x20xf32>
    %cst_90 = arith.constant 1.000000e+00 : f32
    %276 = vector.broadcast %cst_90 : f32 to vector<8x20xf32>
    %277 = arith.addf %275, %276 : vector<8x20xf32>
    %cst_91 = arith.constant 5.000000e-01 : f32
    %278 = vector.broadcast %cst_91 : f32 to vector<8x20xf32>
    %279 = arith.mulf %278, %277 : vector<8x20xf32>
    %280 = vector.extract_strided_slice %263 {offsets = [0, 40], sizes = [8, 20], strides = [1, 1]} : vector<8x80xf32> to vector<8x20xf32>
    %281 = math.tanh %280 : vector<8x20xf32>
    %282 = vector.extract_strided_slice %263 {offsets = [0, 60], sizes = [8, 20], strides = [1, 1]} : vector<8x80xf32> to vector<8x20xf32>
    %cst_92 = arith.constant 5.000000e-01 : f32
    %283 = vector.broadcast %cst_92 : f32 to vector<8x20xf32>
    %284 = arith.mulf %283, %282 : vector<8x20xf32>
    %285 = math.tanh %284 : vector<8x20xf32>
    %cst_93 = arith.constant 1.000000e+00 : f32
    %286 = vector.broadcast %cst_93 : f32 to vector<8x20xf32>
    %287 = arith.addf %285, %286 : vector<8x20xf32>
    %cst_94 = arith.constant 5.000000e-01 : f32
    %288 = vector.broadcast %cst_94 : f32 to vector<8x20xf32>
    %289 = arith.mulf %288, %287 : vector<8x20xf32>
    %290 = arith.mulf %279, %258 : vector<8x20xf32>
    %291 = arith.mulf %271, %281 : vector<8x20xf32>
    %292 = arith.addf %290, %291 : vector<8x20xf32>
    %293 = math.tanh %292 : vector<8x20xf32>
    %294 = arith.mulf %289, %293 : vector<8x20xf32>
    %295 = arith.subf %294, %56 : vector<8x20xf32>
    %c184 = arith.constant 184 : index
    %c0_95 = arith.constant 0 : index
    %296 = vector.load %arg3[%c184, %c0_95] : memref<208x80xf32, #tpu.memory_space<vmem>>, vector<20x10xf32>
    %cst_96 = arith.constant dense<0.000000e+00> : vector<8x10xf32>
    %297 = tpu.matmul %295, %296, %cst_96 {dimension_numbers = #tpu.dot_dimension_numbers<[1], [0], [0], [1], [0, 0, 1, 1], [], []>} : vector<8x20xf32>, vector<20x10xf32>, vector<8x10xf32> -> vector<8x10xf32>
    %c0_97 = arith.constant 0 : index
    %c0_98 = arith.constant 0 : index
    %298 = vector.load %arg2[%c0_97, %c0_98] : memref<8x20xf32, #tpu.memory_space<vmem>>, vector<8x20xf32>
    %299 = math.cos %297 : vector<8x10xf32>
    %300 = vector.extract_strided_slice %298 {offsets = [0, 0], sizes = [8, 10], strides = [1, 1]} : vector<8x20xf32> to vector<8x10xf32>
    %301 = arith.mulf %299, %300 : vector<8x10xf32>
    %302 = math.sin %297 : vector<8x10xf32>
    %303 = vector.extract_strided_slice %298 {offsets = [0, 10], sizes = [8, 10], strides = [1, 1]} : vector<8x20xf32> to vector<8x10xf32>
    %304 = arith.mulf %302, %303 : vector<8x10xf32>
    %305 = arith.addf %301, %304 : vector<8x10xf32>
    %c0_99 = arith.constant 0 : index
    %c0_100 = arith.constant 0 : index
    %306 = vector.load %arg4[%c0_99, %c0_100] : memref<8x10xf32, #tpu.memory_space<vmem>>, vector<8x10xf32>
    tpu.vector_store %arg4[%c0_99, %c0_100], %305 {strides = array<i32>} : memref<8x10xf32, #tpu.memory_space<vmem>>, vector<8x10xf32>,
    return
  }
  func.func @transform_0(%arg0: i32) -> (i32, i32) {
    %c0_i32 = arith.constant 0 : i32
    %c0_i32_0 = arith.constant 0 : i32
    %c0_i32_1 = arith.constant 0 : i32
    return %c0_i32, %c0_i32_0 : i32, i32
  }
  func.func @transform_1(%arg0: i32) -> (i32, i32) {
    %c0_i32 = arith.constant 0 : i32
    %c0_i32_0 = arith.constant 0 : i32
    %c0_i32_1 = arith.constant 0 : i32
    return %c0_i32, %c0_i32_0 : i32, i32
  }
  func.func @transform_2(%arg0: i32) -> (i32, i32) {
    %c0_i32 = arith.constant 0 : i32
    %c0_i32_0 = arith.constant 0 : i32
    %c0_i32_1 = arith.constant 0 : i32
    return %c0_i32, %c0_i32_0 : i32, i32
  }
  func.func @transform_3(%arg0: i32) -> (i32, i32) {
    %c0_i32 = arith.constant 0 : i32
    %c0_i32_0 = arith.constant 0 : i32
    %c0_i32_1 = arith.constant 0 : i32
    return %c0_i32, %c0_i32_0 : i32, i32
  }
}

</mosaic_0001>

<bundles_post_ra>
// kernel: neg.1
= control target key start
LH: loop header
LB: loop body
LE: loop exit
PB: predicated region body
PF: predicated region fallthrough
CT: control target
= control target key end

     0   :  { %s24_s0 = inlined_call_operand.vmem [shape: f32[2,5], index: 0, kind: input, shape index: {}]   ;;  %s25_s1 = inlined_call_operand.vmem [shape: f32[2,5], index: 1, kind: output, shape index: {}]  }
   0x1   :  { %v2_v0 = vld [vmem:[%s24_s0] sm:$0x3] }
   0x2   :  { %v5_v1 = vxor.u32 2147483648, %v2_v0 }
   0x4   :  { %7 = vst [vmem:[%s25_s1] sm:$0x3] %v5_v1 }

// kernel: lstm_dev_so_forward.1
= control target key start
LH: loop header
LB: loop body
LE: loop exit
PB: predicated region body
PF: predicated region fallthrough
CT: control target
= control target key end

     0   :  { %vm52_vm0 = vcmask 1043456   ;;  %vm139_vm1 = vcmask 1041408   ;;  %vm27_vm2 = vcmask 162816   ;;  %vm114_vm3 = vcmask 408576   ;;  %s1127_s6 = smov 88   ;;  %s1128_s9 = smov 20   ;;  %s1467_s2 = inlined_call_operand.vmem [shape: f32[208,80], index: 2, kind: input, shape index: {}]   ;;  %s1468_s0 = inlined_call_operand.vmem [shape: f32[64,20], index: 0, kind: input, shape index: {}]   ;;  %s1469_s1 = inlined_call_operand.vmem [shape: f32[8,20], index: 1, kind: input, shape index: {}]   ;;  %s1470_s3 = inlined_call_operand.vmem [shape: f32[8,10], index: 3, kind: output, shape index: {}]  }
   0x1   :  { %v24_v0 = vld [vmem:[%s1467_s2 + $0x10] sm:$0xf]  ;;  %v23_v1 = vld [vmem:[%s1467_s2 + $0x8] sm:$0xff]  ;;  %v22_v4 = vld [vmem:[%s1467_s2] sm:$0xff]  ;;  %v1126_v25 = vmov 0.0   ;;  %s1129_s10 = smov 40  }
   0x2   :  { %1012 = vmatpush.msk.msra.mxu0 %vm52_vm0, %v24_v0  ;;  %v111_v2 = vld [vmem:[%s1467_s2 + $0x50] sm:$0x3]  ;;  %v110_v3 = vld [vmem:[%s1467_s2 + $0x48] sm:$0xff]  ;;  %v14_v5 = vld [vmem:[%s1468_s0] sm:$0xff]  ;;  %s1130_s11 = smov 68   ;;  %s1131_s4 = smov 118  }
   0x3   :  { %1021 = vmatpush.msk.msra.mxu1 %vm139_vm1, %v111_v2  ;;  %v109_v6 = vld [vmem:[%s1467_s2 + $0x40] sm:$0xff]  ;;  %v108_v7 = vld [vmem:[%s1467_s2 + $0x38] sm:$0xff]  ;;  %v107_v8 = vld [vmem:[%s1467_s2 + $0x30] sm:$0xff] }
   0x4   :  { %70 = vmatpush.msra.mxu0 %v23_v1  ;;  %v106_v9 = vld [vmem:[%s1467_s2 + $0x28] sm:$0xff]  ;;  %v105_v10 = vld [vmem:[%s1467_s2 + $0x20] sm:$0xff]  ;;  %v198_v11 = vld [vmem:[%s1467_s2 + $0x90] sm:$0x3] }
   0x5   :  { %153 = vmatpush.msra.mxu1 %v110_v3  ;;  %v197_v12 = vld [vmem:[%s1467_s2 + $0x88] sm:$0xff]  ;;  %1030 = vmatpush.msk.msra.mxu2 %vm139_vm1, %v198_v11  ;;  %v196_v13 = vld [vmem:[%s1467_s2 + $0x80] sm:$0xff]  ;;  %v195_v14 = vld [vmem:[%s1467_s2 + $0x78] sm:$0xff] }
   0x6   :  { %71 = vmatpush.msra.mxu0 %v22_v4  ;;  %v1211_v15 = vld [vmem:[%s1467_s2 + $0x18] ss:$0 sm:$0xff]  ;;  %v194_v19 = vld [vmem:[%s1467_s2 + $0x70] sm:$0xff]  ;;  %v193_v20 = vld [vmem:[%s1467_s2 + $0x68] sm:$0xff] }
   0x7   :  { %1013 = vmatmul.msk.f32.vlgmr.msra.gmra.mxu0 %vm27_vm2, %v14_v5  ;;  %154 = vmatpush.msra.mxu1 %v109_v6  ;;  %v1224_v21 = vld [vmem:[%s1467_s2 + $0xa8] sm:$0xf]  ;;  %v192_v22 = vld [vmem:[%s1467_s2 + $0x60] sm:$0xff]  ;;  %v1240_v24 = vld [vmem:[%s1467_s2 + $0x98] sm:$0xff] }
   0x8   :  { %238 = vmatpush.msra.mxu2 %v197_v12  ;;  %1039 = vmatpush.msk.msra.mxu3 %vm52_vm0, %v1224_v21  ;;  %v1234_v23 = vld [vmem:[%s1467_s2 + $0xa0] sm:$0xff]  ;;  %v1254_v26 = vld [vmem:[%s1467_s2 + $0x58] ss:$0 sm:$0xff]  ;;  %v1261_v30 = vld [vmem:[%s1467_s2 + $0xb0] ss:$0 sm:$0xff] }
   0x9   :  { %155 = vmatpush.msra.mxu1 %v108_v7  ;;  %v15_v36 = vld [vmem:[%s1468_s0 + $0x8] sm:$0xff]  ;;  %v16_v61 = vld [vmem:[%s1468_s0 + $0x10] sm:$0xff] }
   0xa   :  { %239 = vmatpush.msra.mxu2 %v196_v13  ;;  %292 = vmatpush.msra.mxu3 %v1234_v23 }
   0xb   :  { %156 = vmatpush.msra.mxu1 %v107_v8 }
   0xc   :  { %240 = vmatpush.msra.mxu2 %v195_v14  ;;  %293 = vmatpush.msra.mxu3 %v1240_v24 }
   0xd   :  { %157 = vmatpush.msra.mxu1 %v106_v9  ;;  %294 = vmatmul.f32.vlgmr.msra.gmra.mxu3 %v1126_v25 }
   0xe   :  { %241 = vmatpush.msra.mxu2 %v194_v19  ;;  %1040 = vmatpush.msk.msrb.mxu3 %vm52_vm0, %v1224_v21 }
   0xf   :  { %158 = vmatpush.msra.mxu1 %v105_v10  ;;  %1014 = vmatmul.msk.f32.gmra.mxu0 %vm27_vm2, %v15_v36 }
  0x10   :  { %242 = vmatpush.msra.mxu2 %v193_v20  ;;  %340 = vmatpush.msrb.mxu3 %v1234_v23 }
  0x12   :  { %243 = vmatpush.msra.mxu2 %v192_v22  ;;  %341 = vmatpush.msrb.mxu3 %v1240_v24 }
  0x14   :  { %1042 = vmatpush.msk.msra.mxu3 %vm52_vm0, %v1224_v21 }
  0x16   :  { %388 = vmatpush.msra.mxu3 %v1234_v23 }
  0x17   :  { %1015 = vmatmul.msk.f32.gmra.mxu0 %vm27_vm2, %v16_v61 }
  0x18   :  { %389 = vmatpush.msra.mxu3 %v1240_v24 }
  0x84   :  { %v73_v16 = vpop.f32.mrf.mxu0 }
  0x85   :  { %v74_v17 = vadd.f32 %v1211_v15, %v73_v16 }
  0x87   :  { %v97_v18 = vmax.f32 %v74_v17, 0.0 }
  0x89   :  { %1022 = vmatmul.msk.f32.vlgmr.msra.gmra.mxu1 %vm114_vm3, %v97_v18 }
  0x8c   :  { %v76_v43 = vpop.f32.mrf.mxu0 }
  0x8d   :  { %v77_v44 = vadd.f32 %v1211_v15, %v76_v43 }
  0x8f   :  { %v98_v45 = vmax.f32 %v77_v44, 0.0 }
  0x90   :  { %v295_v32 = vpop.f32.mrf.mxu3 }
  0x91   :  { %1023 = vmatmul.msk.f32.gmra.mxu1 %vm114_vm3, %v98_v45 }
  0x94   :  { %v79_v7 = vpop.f32.mrf.mxu0 }
  0x95   :  { %v80_v8 = vadd.f32 %v1211_v15, %v79_v7 }
  0x97   :  { %v99_v9 = vmax.f32 %v80_v8, 0.0 }
  0x99   :  { %1024 = vmatmul.msk.f32.gmra.mxu1 %vm114_vm3, %v99_v9 }
 0x106   :  { %v160_v27 = vpop.f32.mrf.mxu1 }
 0x107   :  { %v161_v28 = vadd.f32 %v1254_v26, %v160_v27  ;;  %v17_v27 = vld [vmem:[%s1468_s0 + $0x18] sm:$0xff] }
 0x108   :  { %1016 = vmatmul.msk.f32.gmra.mxu0 %vm27_vm2, %v17_v27 }
 0x109   :  { %v184_v29 = vmax.f32 %v161_v28, 0.0 }
 0x10b   :  { %1031 = vmatmul.msk.f32.vlgmr.msra.gmra.mxu2 %vm114_vm3, %v184_v29 }
 0x10e   :  { %v163_v50 = vpop.f32.mrf.mxu1 }
 0x10f   :  { %v164_v51 = vadd.f32 %v1254_v26, %v163_v50 }
 0x111   :  { %v185_v52 = vmax.f32 %v164_v51, 0.0 }
 0x113   :  { %1032 = vmatmul.msk.f32.gmra.mxu2 %vm114_vm3, %v185_v52 }
 0x116   :  { %v166_v13 = vpop.f32.mrf.mxu1 }
 0x117   :  { %v167_v14 = vadd.f32 %v1254_v26, %v166_v13 }
 0x119   :  { %v186_v16 = vmax.f32 %v167_v14, 0.0 }
 0x11b   :  { %1033 = vmatmul.msk.f32.gmra.mxu2 %vm114_vm3, %v186_v16  ;;  %v19_v16 = vld [vmem:[%s1468_s0 + $0x28] sm:$0xff] }
 0x18e   :  { %v245_v31 = vpop.f32.mrf.mxu2 }
 0x18f   :  { %v246_v33 = vadd.f32 %v1261_v30, %v245_v31 }
 0x191   :  { %v298_v34 = vadd.f32 %v295_v32, %v246_v33 }
 0x193   :  { %1078 = vtanh.f32 %v298_v34  ;;  %v299_v37 = vmul.f32 0.5, %v298_v34 }
 0x195   :  { %1080 = vtanh.f32 %v299_v37 }
 0x196   :  { %v248_v56 = vpop.f32.mrf.mxu2 }
 0x197   :  { %v249_v57 = vadd.f32 %v1261_v30, %v248_v56 }
 0x199   :  { %v1079_v35 = vpop.eup %1078 }
 0x19a   :  { %306 = vrot.lane.b32.xlu0 %v1079_v35, %s1127_s6  ;;  %v82_v35 = vpop.f32.mrf.mxu0 }
 0x19b   :  { %v1081_v38 = vpop.eup %1080  ;;  %v83_v36 = vadd.f32 %v1211_v15, %v82_v35 }
 0x19c   :  { %v301_v39 = vadd.f32 1.0, %v1081_v38 }
 0x19d   :  { %v100_v37 = vmax.f32 %v83_v36, 0.0 }
 0x19e   :  { %v302_v40 = vmul.f32 0.5, %v301_v39  ;;  %v251_v18 = vpop.f32.mrf.mxu2 }
 0x19f   :  { %v252_v19 = vadd.f32 %v1261_v30, %v251_v18  ;;  %1025 = vmatmul.msk.f32.gmra.mxu1 %vm114_vm3, %v100_v37 }
 0x1a0   :  { %v304_v46 = vmul.f32 0.0, %v302_v40 }
 0x20c   :  { %v307_v41 = vpop.permute.xlu0 %306 }
 0x20d   :  { %v309_v42 = vmul.f32 %v307_v41, %v302_v40 }
 0x20f   :  { %311 = vrot.lane.b32.xlu0 %v309_v42, %s1128_s9 }
 0x21c   :  { %v169_v42 = vpop.f32.mrf.mxu1 }
 0x21d   :  { %v170_v43 = vadd.f32 %v1254_v26, %v169_v42 }
 0x21f   :  { %v187_v44 = vmax.f32 %v170_v43, 0.0 }
 0x221   :  { %1034 = vmatmul.msk.f32.gmra.mxu2 %vm114_vm3, %v187_v44 }
 0x281   :  { %v312_v47 = vpop.permute.xlu0 %311 }
 0x282   :  { %v314_v48 = vadd.f32 %v312_v47, %v304_v46 }
 0x284   :  { %1082 = vtanh.f32 %v314_v48 }
 0x28a   :  { %v1083_v49 = vpop.eup %1082 }
 0x28b   :  { %317 = vrot.lane.b32.xlu1 %v1083_v49, %s1129_s10 }
 0x2fd   :  { %v318_v53 = vpop.permute.xlu1 %317 }
 0x2fe   :  { %v1275_v54 = vmul.f32 %v318_v53, %v302_v40  ;;  %v18_v53 = vld [vmem:[%s1468_s0 + $0x20] sm:$0xff] }
 0x2ff   :  { %1017 = vmatmul.msk.f32.gmra.mxu0 %vm27_vm2, %v18_v53 }
 0x300   :  { %322 = vrot.lane.b32.xlu1 %v1275_v54, %s1130_s11 }
 0x307   :  { %1018 = vmatmul.msk.f32.gmra.mxu0 %vm27_vm2, %v19_v16 }
 0x372   :  { %v323_v55 = vpop.permute.xlu1 %322 }
 0x373   :  { %1041 = vmatmul.msk.f32.vlgmr.msrb.gmra.mxu3 %vm27_vm2, %v323_v55 }
 0x374   :  { %1044 = vmatpush.msk.msrb.mxu3 %vm52_vm0, %v1224_v21 }
 0x376   :  { %436 = vmatpush.msrb.mxu3 %v1234_v23 }
 0x378   :  { %437 = vmatpush.msrb.mxu3 %v1240_v24 }
 0x37c   :  { %v85_v61 = vpop.f32.mrf.mxu0 }
 0x3f6   :  { %v343_v58 = vpop.f32.mrf.mxu3 }
 0x3f7   :  { %v346_v59 = vadd.f32 %v343_v58, %v249_v57 }
 0x3f9   :  { %1084 = vtanh.f32 %v346_v59  ;;  %v347_v62 = vmul.f32 0.5, %v346_v59 }
 0x3fb   :  { %1086 = vtanh.f32 %v347_v62  ;;  %v86_v62 = vadd.f32 %v1211_v15, %v85_v61 }
 0x3ff   :  { %v1085_v60 = vpop.eup %1084 }
 0x400   :  { %354 = vrot.lane.b32.xlu2 %v1085_v60, %s1127_s6 }
 0x401   :  { %v1087_v63 = vpop.eup %1086 }
 0x402   :  { %v349_v0 = vadd.f32 1.0, %v1087_v63  ;;  %v101_v63 = vmax.f32 %v86_v62, 0.0 }
 0x404   :  { %v350_v1 = vmul.f32 0.5, %v349_v0  ;;  %1026 = vmatmul.msk.f32.gmra.mxu1 %vm114_vm3, %v101_v63 }
 0x406   :  { %v352_v4 = vmul.f32 %v350_v1, %v314_v48  ;;  %v254_v48 = vpop.f32.mrf.mxu2 }
 0x407   :  { %v255_v49 = vadd.f32 %v1261_v30, %v254_v48 }
 0x45a   :  { %v355_v2 = vpop.permute.xlu2 %354 }
 0x45b   :  { %v357_v3 = vmul.f32 %v355_v2, %v350_v1 }
 0x45d   :  { %359 = vrot.lane.b32.xlu2 %v357_v3, %s1128_s9 }
 0x4b7   :  { %v360_v5 = vpop.permute.xlu2 %359 }
 0x4b8   :  { %v362_v6 = vadd.f32 %v360_v5, %v352_v4 }
 0x4ba   :  { %1088 = vtanh.f32 %v362_v6 }
 0x4c0   :  { %v1089_v10 = vpop.eup %1088 }
 0x4c1   :  { %365 = vrot.lane.b32.xlu0 %v1089_v10, %s1129_s10 }
 0x533   :  { %v366_v11 = vpop.permute.xlu0 %365 }
 0x534   :  { %v368_v12 = vmul.f32 %v366_v11, %v350_v1 }
 0x536   :  { %370 = vrot.lane.b32.xlu1 %v368_v12, %s1130_s11 }
 0x5a8   :  { %v371_v17 = vpop.permute.xlu1 %370 }
 0x5a9   :  { %1043 = vmatmul.msk.f32.vlgmr.msra.gmra.mxu3 %vm27_vm2, %v371_v17 }
 0x5aa   :  { %1046 = vmatpush.msk.msra.mxu3 %vm52_vm0, %v1224_v21 }
 0x5ac   :  { %484 = vmatpush.msra.mxu3 %v1234_v23 }
 0x5ae   :  { %485 = vmatpush.msra.mxu3 %v1240_v24 }
 0x62c   :  { %v391_v20 = vpop.f32.mrf.mxu3 }
 0x62d   :  { %v394_v22 = vadd.f32 %v391_v20, %v252_v19 }
 0x62f   :  { %1090 = vtanh.f32 %v394_v22  ;;  %v395_v28 = vmul.f32 0.5, %v394_v22 }
 0x631   :  { %1092 = vtanh.f32 %v395_v28 }
 0x635   :  { %v1091_v25 = vpop.eup %1090 }
 0x636   :  { %402 = vrot.lane.b32.xlu2 %v1091_v25, %s1127_s6 }
 0x637   :  { %v1093_v29 = vpop.eup %1092 }
 0x638   :  { %v397_v31 = vadd.f32 1.0, %v1093_v29 }
 0x63a   :  { %v398_v32 = vmul.f32 0.5, %v397_v31  ;;  %v88_v31 = vpop.f32.mrf.mxu0 }
 0x63c   :  { %v400_v38 = vmul.f32 %v398_v32, %v362_v6  ;;  %v172_v6 = vpop.f32.mrf.mxu1 }
 0x63d   :  { %v173_v7 = vadd.f32 %v1254_v26, %v172_v6 }
 0x63f   :  { %v188_v8 = vmax.f32 %v173_v7, 0.0 }
 0x641   :  { %1035 = vmatmul.msk.f32.gmra.mxu2 %vm114_vm3, %v188_v8 }
 0x690   :  { %v403_v33 = vpop.permute.xlu2 %402 }
 0x691   :  { %v405_v34 = vmul.f32 %v403_v33, %v398_v32 }
 0x693   :  { %407 = vrot.lane.b32.xlu0 %v405_v34, %s1128_s9 }
 0x6c4   :  { %v257_v10 = vpop.f32.mrf.mxu2 }
 0x6c5   :  { %v258_v11 = vadd.f32 %v1261_v30, %v257_v10 }
 0x705   :  { %v408_v39 = vpop.permute.xlu0 %407 }
 0x706   :  { %v410_v40 = vadd.f32 %v408_v39, %v400_v38 }
 0x708   :  { %1094 = vtanh.f32 %v410_v40 }
 0x70e   :  { %v1095_v41 = vpop.eup %1094 }
 0x70f   :  { %413 = vrot.lane.b32.xlu1 %v1095_v41, %s1129_s10 }
 0x781   :  { %v414_v45 = vpop.permute.xlu1 %413 }
 0x782   :  { %v416_v46 = vmul.f32 %v414_v45, %v398_v32  ;;  %v89_v32 = vadd.f32 %v1211_v15, %v88_v31 }
 0x784   :  { %418 = vrot.lane.b32.xlu2 %v416_v46, %s1130_s11  ;;  %v102_v33 = vmax.f32 %v89_v32, 0.0  ;;  %v20_v46 = vld [vmem:[%s1468_s0 + $0x30] sm:$0xff] }
 0x785   :  { %1019 = vmatmul.msk.f32.gmra.mxu0 %vm27_vm2, %v20_v46 }
 0x786   :  { %1027 = vmatmul.msk.f32.gmra.mxu1 %vm114_vm3, %v102_v33 }
 0x7de   :  { %v419_v47 = vpop.permute.xlu2 %418 }
 0x7df   :  { %1045 = vmatmul.msk.f32.vlgmr.msrb.gmra.mxu3 %vm27_vm2, %v419_v47 }
 0x7e0   :  { %1048 = vmatpush.msk.msrb.mxu3 %vm52_vm0, %v1224_v21 }
 0x7e2   :  { %532 = vmatpush.msrb.mxu3 %v1234_v23 }
 0x7e4   :  { %533 = vmatpush.msrb.mxu3 %v1240_v24 }
 0x803   :  { %v175_v37 = vpop.f32.mrf.mxu1 }
 0x804   :  { %v176_v38 = vadd.f32 %v1254_v26, %v175_v37 }
 0x806   :  { %v189_v39 = vmax.f32 %v176_v38, 0.0 }
 0x808   :  { %1036 = vmatmul.msk.f32.gmra.mxu2 %vm114_vm3, %v189_v39 }
 0x862   :  { %v439_v50 = vpop.f32.mrf.mxu3 }
 0x863   :  { %v442_v51 = vadd.f32 %v439_v50, %v255_v49  ;;  %v91_v50 = vpop.f32.mrf.mxu0 }
 0x865   :  { %1096 = vtanh.f32 %v442_v51  ;;  %v443_v55 = vmul.f32 0.5, %v442_v51  ;;  %v92_v51 = vadd.f32 %v1211_v15, %v91_v50 }
 0x867   :  { %1098 = vtanh.f32 %v443_v55 }
 0x86b   :  { %v1097_v52 = vpop.eup %1096 }
 0x86c   :  { %450 = vrot.lane.b32.xlu0 %v1097_v52, %s1127_s6  ;;  %v103_v52 = vmax.f32 %v92_v51, 0.0 }
 0x86d   :  { %v1099_v56 = vpop.eup %1098 }
 0x86e   :  { %v445_v57 = vadd.f32 1.0, %v1099_v56  ;;  %1028 = vmatmul.msk.f32.gmra.mxu1 %vm114_vm3, %v103_v52 }
 0x870   :  { %v446_v58 = vmul.f32 0.5, %v445_v57 }
 0x872   :  { %v448_v0 = vmul.f32 %v446_v58, %v410_v40 }
 0x88b   :  { %v260_v41 = vpop.f32.mrf.mxu2 }
 0x88c   :  { %v261_v42 = vadd.f32 %v1261_v30, %v260_v41 }
 0x8de   :  { %v451_v59 = vpop.permute.xlu0 %450 }
 0x8df   :  { %v453_v60 = vmul.f32 %v451_v59, %v446_v58 }
 0x8e1   :  { %455 = vrot.lane.b32.xlu1 %v453_v60, %s1128_s9 }
 0x953   :  { %v456_v1 = vpop.permute.xlu1 %455 }
 0x954   :  { %v458_v2 = vadd.f32 %v456_v1, %v448_v0 }
 0x956   :  { %1100 = vtanh.f32 %v458_v2 }
 0x95c   :  { %v1101_v3 = vpop.eup %1100 }
 0x95d   :  { %461 = vrot.lane.b32.xlu2 %v1101_v3, %s1129_s10 }
 0x9b7   :  { %v462_v4 = vpop.permute.xlu2 %461 }
 0x9b8   :  { %v464_v5 = vmul.f32 %v462_v4, %v446_v58  ;;  %v178_v58 = vpop.f32.mrf.mxu1 }
 0x9b9   :  { %v179_v59 = vadd.f32 %v1254_v26, %v178_v58 }
 0x9ba   :  { %466 = vrot.lane.b32.xlu0 %v464_v5, %s1130_s11  ;;  %v21_v5 = vld [vmem:[%s1468_s0 + $0x38] sm:$0xff] }
 0x9bb   :  { %v190_v60 = vmax.f32 %v179_v59, 0.0  ;;  %1020 = vmatmul.msk.f32.gmra.mxu0 %vm27_vm2, %v21_v5 }
 0x9bd   :  { %1037 = vmatmul.msk.f32.gmra.mxu2 %vm114_vm3, %v190_v60  ;;  %v1132_v60 = vmov 683565275  }
 0xa2c   :  { %v467_v9 = vpop.permute.xlu0 %466 }
 0xa2d   :  { %1047 = vmatmul.msk.f32.vlgmr.msra.gmra.mxu3 %vm27_vm2, %v467_v9 }
 0xa2e   :  { %1050 = vmatpush.msk.msra.mxu3 %vm52_vm0, %v1224_v21 }
 0xa30   :  { %580 = vmatpush.msra.mxu3 %v1234_v23 }
 0xa32   :  { %581 = vmatpush.msra.mxu3 %v1240_v24 }
 0xa40   :  { %v263_v0 = vpop.f32.mrf.mxu2 }
 0xa41   :  { %v264_v1 = vadd.f32 %v1261_v30, %v263_v0 }
 0xab0   :  { %v487_v12 = vpop.f32.mrf.mxu3 }
 0xab1   :  { %v490_v13 = vadd.f32 %v487_v12, %v258_v11  ;;  %v94_v12 = vpop.f32.mrf.mxu0 }
 0xab3   :  { %1102 = vtanh.f32 %v490_v13  ;;  %v491_v17 = vmul.f32 0.5, %v490_v13  ;;  %v95_v13 = vadd.f32 %v1211_v15, %v94_v12 }
 0xab5   :  { %1104 = vtanh.f32 %v491_v17 }
 0xab9   :  { %v1103_v14 = vpop.eup %1102 }
 0xaba   :  { %498 = vrot.lane.b32.xlu1 %v1103_v14, %s1127_s6  ;;  %v104_v14 = vmax.f32 %v95_v13, 0.0 }
 0xabb   :  { %v1105_v18 = vpop.eup %1104 }
 0xabc   :  { %v493_v19 = vadd.f32 1.0, %v1105_v18  ;;  %1029 = vmatmul.msk.f32.gmra.mxu1 %vm114_vm3, %v104_v14 }
 0xabe   :  { %v494_v20 = vmul.f32 0.5, %v493_v19 }
 0xac0   :  { %v496_v27 = vmul.f32 %v494_v20, %v458_v2 }
 0xb2c   :  { %v499_v22 = vpop.permute.xlu1 %498 }
 0xb2d   :  { %v501_v25 = vmul.f32 %v499_v22, %v494_v20 }
 0xb2f   :  { %503 = vrot.lane.b32.xlu2 %v501_v25, %s1128_s9 }
 0xb39   :  { %v181_v25 = vpop.f32.mrf.mxu1 }
 0xb89   :  { %v504_v28 = vpop.permute.xlu2 %503 }
 0xb8a   :  { %v506_v29 = vadd.f32 %v504_v28, %v496_v27  ;;  %v182_v27 = vadd.f32 %v1254_v26, %v181_v25 }
 0xb8c   :  { %1106 = vtanh.f32 %v506_v29  ;;  %v191_v28 = vmax.f32 %v182_v27, 0.0 }
 0xb8e   :  { %1038 = vmatmul.msk.f32.gmra.mxu2 %vm114_vm3, %v191_v28 }
 0xb92   :  { %v1107_v34 = vpop.eup %1106 }
 0xb93   :  { %509 = vrot.lane.b32.xlu0 %v1107_v34, %s1129_s10 }
 0xc05   :  { %v510_v35 = vpop.permute.xlu0 %509 }
 0xc06   :  { %v512_v36 = vmul.f32 %v510_v35, %v494_v20 }
 0xc08   :  { %514 = vrot.lane.b32.xlu1 %v512_v36, %s1130_s11 }
 0xc7a   :  { %v515_v40 = vpop.permute.xlu1 %514 }
 0xc7b   :  { %1049 = vmatmul.msk.f32.vlgmr.msrb.gmra.mxu3 %vm27_vm2, %v515_v40 }
 0xc7c   :  { %1052 = vmatpush.msk.msrb.mxu3 %vm52_vm0, %v1224_v21 }
 0xc7e   :  { %628 = vmatpush.msrb.mxu3 %v1234_v23 }
 0xc80   :  { %629 = vmatpush.msrb.mxu3 %v1240_v24 }
 0xcfe   :  { %v535_v43 = vpop.f32.mrf.mxu3 }
 0xcff   :  { %v538_v44 = vadd.f32 %v535_v43, %v261_v42  ;;  %v660_v43 = vld [vmem:[%s1467_s2 + $0xc8] sm:$0xf] }
 0xd00   :  { %1054 = vmatpush.msk.msrb.mxu0 %vm52_vm0, %v660_v43 }
 0xd01   :  { %1108 = vtanh.f32 %v538_v44  ;;  %v539_v21 = vmul.f32 0.5, %v538_v44  ;;  %v659_v44 = vld [vmem:[%s1467_s2 + $0xc0] sm:$0xff] }
 0xd02   :  { %683 = vmatpush.msrb.mxu0 %v659_v44 }
 0xd03   :  { %1110 = vtanh.f32 %v539_v21 }
 0xd07   :  { %v1109_v45 = vpop.eup %1108 }
 0xd08   :  { %546 = vrot.lane.b32.xlu2 %v1109_v45, %s1127_s6  ;;  %v658_v45 = vld [vmem:[%s1467_s2 + $0xb8] sm:$0xff] }
 0xd09   :  { %v1111_v23 = vpop.eup %1110  ;;  %684 = vmatpush.msrb.mxu0 %v658_v45 }
 0xd0a   :  { %v541_v47 = vadd.f32 1.0, %v1111_v23 }
 0xd0c   :  { %v542_v24 = vmul.f32 0.5, %v541_v47 }
 0xd0e   :  { %v544_v53 = vmul.f32 %v542_v24, %v506_v29  ;;  %v266_v29 = vpop.f32.mrf.mxu2 }
 0xd0f   :  { %v267_v31 = vadd.f32 %v1261_v30, %v266_v29 }
 0xd62   :  { %v547_v48 = vpop.permute.xlu2 %546 }
 0xd63   :  { %v549_v49 = vmul.f32 %v547_v48, %v542_v24 }
 0xd65   :  { %551 = vrot.lane.b32.xlu0 %v549_v49, %s1128_s9 }
 0xdd7   :  { %v552_v55 = vpop.permute.xlu0 %551 }
 0xdd8   :  { %v554_v56 = vadd.f32 %v552_v55, %v544_v53 }
 0xdda   :  { %1112 = vtanh.f32 %v554_v56 }
 0xde0   :  { %v1113_v57 = vpop.eup %1112 }
 0xde1   :  { %557 = vrot.lane.b32.xlu1 %v1113_v57, %s1129_s10 }
 0xe53   :  { %v558_v61 = vpop.permute.xlu1 %557 }
 0xe54   :  { %v560_v62 = vmul.f32 %v558_v61, %v542_v24  ;;  %v1404_v24 = vld [vmem:[%s1469_s1] sm:$0xff] }
 0xe56   :  { %562 = vrot.lane.b32.xlu2 %v560_v62, %s1130_s11  ;;  %v1133_v62 = vmov 2475754826  }
 0xeb0   :  { %v563_v63 = vpop.permute.xlu2 %562 }
 0xeb1   :  { %1051 = vmatmul.msk.f32.vlgmr.msra.gmra.mxu3 %vm27_vm2, %v563_v63 }
 0xf34   :  { %v583_v2 = vpop.f32.mrf.mxu3 }
 0xf35   :  { %v586_v3 = vadd.f32 %v583_v2, %v264_v1  ;;  %v1134_v1 = vmov 2131351028  }
 0xf37   :  { %1114 = vtanh.f32 %v586_v3  ;;  %v587_v6 = vmul.f32 0.5, %v586_v3 }
 0xf39   :  { %1116 = vtanh.f32 %v587_v6 }
 0xf3d   :  { %v1115_v4 = vpop.eup %1114 }
 0xf3e   :  { %594 = vrot.lane.b32.xlu0 %v1115_v4, %s1127_s6  ;;  %v1135_v4 = vmov 2102212464  }
 0xf3f   :  { %v1117_v7 = vpop.eup %1116 }
 0xf40   :  { %v589_v8 = vadd.f32 1.0, %v1117_v7  ;;  %v1136_v7 = vmov 920167782  }
 0xf42   :  { %v590_v9 = vmul.f32 0.5, %v589_v8 }
 0xf44   :  { %v592_v16 = vmul.f32 %v590_v9, %v554_v56 }
 0xfb0   :  { %v595_v10 = vpop.permute.xlu0 %594 }
 0xfb1   :  { %v597_v11 = vmul.f32 %v595_v10, %v590_v9  ;;  %v1137_v10 = vmov 1326507024  }
 0xfb3   :  { %599 = vrot.lane.b32.xlu1 %v597_v11, %s1128_s9 }
0x1025   :  { %v600_v17 = vpop.permute.xlu1 %599 }
0x1026   :  { %v602_v18 = vadd.f32 %v600_v17, %v592_v16 }
0x1028   :  { %1118 = vtanh.f32 %v602_v18 }
0x102e   :  { %v1119_v19 = vpop.eup %1118 }
0x102f   :  { %605 = vrot.lane.b32.xlu2 %v1119_v19, %s1129_s10 }
0x1089   :  { %v606_v20 = vpop.permute.xlu2 %605 }
0x108a   :  { %v608_v22 = vmul.f32 %v606_v20, %v590_v9 }
0x108c   :  { %610 = vrot.lane.b32.xlu0 %v608_v22, %s1130_s11 }
0x10fe   :  { %v611_v15 = vpop.permute.xlu0 %610 }
0x10ff   :  { %1053 = vmatmul.msk.f32.vlgmr.msrb.gmra.mxu3 %vm27_vm2, %v611_v15 }
0x1182   :  { %v631_v32 = vpop.f32.mrf.mxu3 }
0x1183   :  { %v634_v33 = vadd.f32 %v631_v32, %v267_v31 }
0x1185   :  { %1120 = vtanh.f32 %v634_v33  ;;  %v635_v35 = vmul.f32 0.5, %v634_v33 }
0x1187   :  { %1122 = vtanh.f32 %v635_v35 }
0x118b   :  { %v1121_v34 = vpop.eup %1120 }
0x118c   :  { %642 = vrot.lane.b32.xlu1 %v1121_v34, %s1127_s6 }
0x118d   :  { %v1123_v36 = vpop.eup %1122 }
0x118e   :  { %v637_v37 = vadd.f32 1.0, %v1123_v36 }
0x1190   :  { %v638_v26 = vmul.f32 0.5, %v637_v37 }
0x1192   :  { %v640_v40 = vmul.f32 %v638_v26, %v602_v18 }
0x11fe   :  { %v643_v38 = vpop.permute.xlu1 %642 }
0x11ff   :  { %v645_v39 = vmul.f32 %v643_v38, %v638_v26 }
0x1201   :  { %647 = vrot.lane.b32.xlu2 %v645_v39, %s1128_s9 }
0x1209   :  { %1001 = vrot.lane.b32.xlu2 %v1404_v24, %s1131_s4 }
0x125b   :  { %v648_v41 = vpop.permute.xlu2 %647 }
0x125c   :  { %v650_v42 = vadd.f32 %v648_v41, %v640_v40 }
0x125e   :  { %1124 = vtanh.f32 %v650_v42 }
0x1264   :  { %v1125_v30 = vpop.eup %1124 }
0x1265   :  { %653 = vrot.lane.b32.xlu0 %v1125_v30, %s1129_s10 }
0x12d7   :  { %v654_v46 = vpop.permute.xlu0 %653 }
0x12d8   :  { %v656_v21 = vmul.f32 %v654_v46, %v638_v26 }
0x12da   :  { %v657_v23 = vsub.f32 %v656_v21, %v1275_v54  ;;  %v1138_v21 = vmov 0  }
0x12dc   :  { %662 = vrot.lane.b32.xlu1 %v657_v23, %s1130_s11 }
0x134e   :  { %v663_v47 = vpop.permute.xlu1 %662 }
0x134f   :  { %1055 = vmatmul.msk.f32.vlgmr.msrb.gmra.mxu0 %vm27_vm2, %v663_v47 }
0x13cc   :  { %v1407_v48 = vpop.f32.mrf.mxu0 }
0x13cd   :  { %v693_v49 = vand.u32 2139095040, %v1407_v48  ;;  %v690_v54 = vand.u32 2147483647, %v1407_v48  ;;  %vm692_vm0 = vcmp.lt.s32.totalorder %v1407_v48, 0 }
0x13cf   :  { %v694_v50 = vshrl.u32 %v693_v49, 23  ;;  %v697_v53 = vand.u32 8388607, %v690_v54  ;;  %vm691_vm1 = vcmp.le.f32.partialorder %v690_v54, 0.7853982 }
0x13d1   :  { %v1056_v51 = vadd.s32 4294967169, %v694_v50  ;;  %v698_v58 = vor.u32 8388608, %v697_v53 }
0x13d3   :  { %v700_v52 = vadd.s32 1, %v1056_v51  ;;  %v1424_v18 = vshll.u32 %v698_v58, 8 }
0x13d5   :  { %vm701_vm4 = vcmp.gt.s32.totalorder %v700_v52, 0  ;;  %v739_v31 = vand.u32 65535, %v1424_v18  ;;  %v740_v32 = vshrl.u32 %v1424_v18, 16 }
0x13d6   :  { %v702_v55 = vsel %vm701_vm4, %v700_v52, 0 }
0x13d7   :  { %v704_v56 = vand.u32 31, %v702_v55  ;;  %v1415_v59 = vshrl.u32 %v702_v55, 5 }
0x13d9   :  { %v1413_v57 = vsub.s32 32, %v704_v56  ;;  %v707_v61 = vshll.u32 %v1132_v60, %v704_v56  ;;  %v710_v63 = vshll.u32 %v1133_v62, %v704_v56  ;;  %v713_v3 = vshll.u32 %v1134_v1, %v704_v56 }
0x13da   :  { %v716_v6 = vshll.u32 %v1135_v4, %v704_v56  ;;  %v719_v9 = vshll.u32 %v1136_v7, %v704_v56  ;;  %vm722_vm5 = vcmp.lt.s32.totalorder %v1415_v59, 1  ;;  %vm725_vm6 = vcmp.lt.s32.totalorder %v1415_v59, 4 }
0x13db   :  { %v708_v0 = vshrl.u32 %v1133_v62, %v1413_v57  ;;  %v711_v2 = vshrl.u32 %v1134_v1, %v1413_v57  ;;  %v714_v5 = vshrl.u32 %v1135_v4, %v1413_v57  ;;  %v717_v8 = vshrl.u32 %v1136_v7, %v1413_v57 }
0x13dc   :  { %v720_v11 = vshrl.u32 %v1137_v10, %v1413_v57  ;;  %vm724_vm7 = vcmp.lt.s32.totalorder %v1415_v59, 3  ;;  %vm723_vm8 = vcmp.lt.s32.totalorder %v1415_v59, 2  ;;  %v706_v56 = vshrl.u32 %v1132_v60, %v1413_v57 }
0x13dd   :  { %v709_v12 = vor.u32 %v708_v0, %v707_v61  ;;  %v712_v13 = vor.u32 %v711_v2, %v710_v63  ;;  %v715_v14 = vor.u32 %v714_v5, %v713_v3  ;;  %v718_v16 = vor.u32 %v717_v8, %v716_v6 }
0x13de   :  { %v721_v17 = vor.u32 %v720_v11, %v719_v9 }
0x13df   :  { %v730_v19 = vsel %vm722_vm5, %v709_v12, %v712_v13  ;;  %v734_v20 = vsel %vm722_vm5, %v712_v13, %v715_v14  ;;  %v731_v22 = vsel %vm725_vm6, %v718_v16, 920167782  ;;  %v727_v52 = vsel %vm725_vm6, %v715_v14, 2102212464 }
0x13e0   :  { %v735_v25 = vsel %vm725_vm6, %v721_v17, 1326507024  ;;  %v732_v27 = vsel %vm724_vm7, %v715_v14, %v731_v22  ;;  %v726_v1 = vsel %vm722_vm5, %v706_v56, %v709_v12  ;;  %v728_v2 = vsel %vm724_vm7, %v712_v13, %v727_v52 }
0x13e1   :  { %v736_v28 = vsel %vm724_vm7, %v718_v16, %v735_v25  ;;  %v733_v15 = vsel %vm723_vm8, %v730_v19, %v732_v27  ;;  %v729_v57 = vsel %vm723_vm8, %v726_v1, %v728_v2 }
0x13e2   :  { %v737_v29 = vsel %vm723_vm8, %v734_v20, %v736_v28  ;;  %v763_v35 = vand.u32 65535, %v733_v15  ;;  %v764_v36 = vshrl.u32 %v733_v15, 16  ;;  %v783_v10 = vmul.u32 %v1424_v18, %v729_v57 }
0x13e3   :  { %v741_v33 = vand.u32 65535, %v737_v29  ;;  %v742_v34 = vshrl.u32 %v737_v29, 16  ;;  %vm833_vm8 = vweird.f32 %v1407_v48 }
0x13e4   :  { %v766_v38 = vmul.u32 %v764_v36, %v739_v31  ;;  %v767_v39 = vmul.u32 %v763_v35, %v740_v32  ;;  %v765_v30 = vmul.u32 %v763_v35, %v739_v31  ;;  %v768_v46 = vmul.u32 %v764_v36, %v740_v32 }
0x13e5   :  { %v744_v37 = vmul.u32 %v742_v34, %v739_v31  ;;  %v745_v26 = vmul.u32 %v741_v33, %v740_v32  ;;  %v743_v40 = vmul.u32 %v741_v33, %v739_v31  ;;  %v746_v42 = vmul.u32 %v742_v34, %v740_v32 }
0x13e6   :  { %v769_v43 = vshll.u32 %v766_v38, 16  ;;  %v771_v47 = vshll.u32 %v767_v39, 16  ;;  %v770_v63 = vshrl.u32 %v766_v38, 16  ;;  %v772_v5 = vshrl.u32 %v767_v39, 16 }
0x13e7   :  { %v747_v41 = vshll.u32 %v744_v37, 16  ;;  %v749_v44 = vshll.u32 %v745_v26, 16  ;;  %v748_v58 = vshrl.u32 %v744_v37, 16  ;;  %v750_v3 = vshrl.u32 %v745_v26, 16 }
0x13e8   :  { %vm773_vm10 = vc.u32 %v765_v30, %v769_v43  ;;  %v775_v49 = vadd.s32 %v769_v43, %v765_v30 }
0x13e9   :  { %vm751_vm9 = vc.u32 %v743_v40, %v747_v41  ;;  %v753_v45 = vadd.s32 %v747_v41, %v743_v40  ;;  %v774_v51 = vsel %vm773_vm10, 1, %v1138_v21 }
0x13ea   :  { %v752_v23 = vsel %vm751_vm9, 1, %v1138_v21  ;;  %v776_v55 = vadd.s32 %v774_v51, %v768_v46  ;;  %vm777_vm12 = vc.u32 %v775_v49, %v771_v47  ;;  %v779_v8 = vadd.s32 %v775_v49, %v771_v47 }
0x13eb   :  { %v754_v50 = vadd.s32 %v752_v23, %v746_v42  ;;  %vm755_vm11 = vc.u32 %v753_v45, %v749_v44  ;;  %v778_v62 = vsel %vm777_vm12, 1, %v1138_v21  ;;  %vm1006_vm9 = vcmask 80896  }
0x13ec   :  { %v756_v53 = vsel %vm755_vm11, 1, %v1138_v21  ;;  %v780_v0 = vadd.s32 %v778_v62, %v776_v55 }
0x13ed   :  { %v758_v61 = vadd.s32 %v756_v53, %v754_v50 }
0x13ee   :  { %v781_v6 = vadd.s32 %v780_v0, %v770_v63  ;;  %v1002_v63 = vpop.permute.xlu2 %1001 }
0x13ef   :  { %v759_v4 = vadd.s32 %v758_v61, %v748_v58 }
0x13f0   :  { %v782_v60 = vadd.s32 %v781_v6, %v772_v5 }
0x13f1   :  { %v760_v7 = vadd.s32 %v759_v4, %v750_v3 }
0x13f2   :  { %v786_v9 = vadd.s32 1, %v782_v60 }
0x13f3   :  { %vm785_vm13 = vc.u32 %v760_v7, %v779_v8  ;;  %v784_v59 = vadd.s32 %v779_v8, %v760_v7 }
0x13f4   :  { %v787_v11 = vsel %vm785_vm13, %v786_v9, %v782_v60 }
0x13f5   :  { %v788_v14 = vadd.s32 %v787_v11, %v783_v10 }
0x13f7   :  { %v789_v12 = vadd.s32 536870912, %v788_v14 }
0x13f9   :  { %v790_v16 = vshrl.u32 %v789_v12, 30 }
0x13fb   :  { %v791_v17 = vshll.u32 %v790_v16, 30  ;;  %v814_v39 = vsub.s32 4, %v790_v16 }
0x13fd   :  { %v792_v13 = vsub.s32 %v788_v14, %v791_v17  ;;  %v815_v43 = vsel %vm692_vm0, %v814_v39, %v790_v16 }
0x13fe   :  { %v817_v46 = vsel %vm691_vm1, 0, %v815_v43 }
0x13ff   :  { %vm793_vm14 = vcmp.lt.s32.totalorder %v792_v13, 0  ;;  %v794_v19 = vsub.s32 0, %v792_v13  ;;  %v989_v50 = vadd.s32 3, %v817_v46  ;;  %v834_v54 = vand.u32 3, %v817_v46 }
0x1401   :  { %v795_v20 = vsel %vm793_vm14, %v794_v19, %v792_v13  ;;  %v990_v56 = vand.u32 3, %v989_v50  ;;  %vm835_vm2 = vcmp.lt.s32.totalorder %v834_v54, 2  ;;  %vm836_vm3 = vcmp.eq.s32.totalorder %v834_v54, 0 }
0x1402   :  { %v796_v22 = vclz %v795_v20  ;;  %vm839_vm4 = vcmp.eq.s32.totalorder %v834_v54, 2 }
0x1403   :  { %vm991_vm5 = vcmp.lt.s32.totalorder %v990_v56, 2  ;;  %vm992_vm6 = vcmp.eq.s32.totalorder %v990_v56, 0  ;;  %vm995_vm7 = vcmp.eq.s32.totalorder %v990_v56, 2 }
0x1404   :  { %v1057_v25 = vadd.s32 4294967294, %v796_v22 }
0x1406   :  { %vm1058_vm15 = vcmp.lt.s32.totalorder %v1057_v25, 0 }
0x1407   :  { %v799_v27 = vsel %vm1058_vm15, 0, %v1057_v25 }
0x1408   :  { %v800_v28 = vsub.s32 32, %v799_v27  ;;  %v804_v15 = vsub.s32 4294967266, %v799_v27  ;;  %v801_v29 = vshll.u32 %v792_v13, %v799_v27 }
0x140a   :  { %v802_v31 = vshrl.u32 %v784_v59, %v800_v28  ;;  %v805_v32 = vadd.s32 127, %v804_v15 }
0x140c   :  { %v803_v18 = vor.u32 %v802_v31, %v801_v29  ;;  %v806_v33 = vshll.u32 %v805_v32, 23 }
0x140e   :  { %v807_v34 = vor.u32 4788187, %v806_v33  ;;  %v810_v36 = vcvt.s32.f32 %v803_v18 }
0x1410   :  { %v808_v35 = vand.u32 2147483647, %v807_v34 }
0x1412   :  { %v811_v37 = vmul.f32 %v810_v36, %v808_v35 }
0x1414   :  { %v812_v26 = vxor.u32 2147483648, %v811_v37 }
0x1416   :  { %v813_v38 = vsel %vm692_vm0, %v812_v26, %v811_v37 }
0x1417   :  { %v816_v40 = vsel %vm691_vm1, %v1407_v48, %v813_v38 }
0x1418   :  { %v818_v41 = vmul.f32 %v816_v40, %v816_v40 }
0x141a   :  { %v826_v42 = vmul.f32 -0.00019511016, %v818_v41  ;;  %v819_v30 = vmul.f32 -0.001358992, %v818_v41 }
0x141c   :  { %v827_v44 = vadd.f32 0.008332121, %v826_v42  ;;  %v820_v45 = vadd.f32 0.041655596, %v819_v30 }
0x141e   :  { %v828_v21 = vmul.f32 %v827_v44, %v818_v41  ;;  %v821_v23 = vmul.f32 %v820_v45, %v818_v41 }
0x1420   :  { %v829_v47 = vadd.f32 -0.16666654, %v828_v21  ;;  %v822_v49 = vadd.f32 -0.4999988, %v821_v23 }
0x1422   :  { %v830_v51 = vmul.f32 %v829_v47, %v818_v41  ;;  %v823_v52 = vmul.f32 %v822_v49, %v818_v41 }
0x1424   :  { %v831_v53 = vadd.f32 1.0, %v830_v51  ;;  %v824_v55 = vadd.f32 1.0, %v823_v52 }
0x1426   :  { %v832_v58 = vmul.f32 %v831_v53, %v816_v40  ;;  %v840_v61 = vxor.u32 2147483648, %v824_v55 }
0x1428   :  { %v837_v62 = vxor.u32 2147483648, %v832_v58  ;;  %v841_v1 = vsel %vm839_vm4, %v840_v61, %v832_v58  ;;  %v997_v3 = vsel %vm995_vm7, %v840_v61, %v832_v58 }
0x142a   :  { %v838_v0 = vsel %vm836_vm3, %v824_v55, %v837_v62  ;;  %v994_v2 = vsel %vm992_vm6, %v824_v55, %v837_v62 }
0x142b   :  { %v842_v4 = vsel %vm835_vm2, %v838_v0, %v841_v1  ;;  %v998_v5 = vsel %vm991_vm5, %v994_v2, %v997_v3 }
0x142c   :  { %v843_v6 = vsel %vm833_vm8, nan, %v842_v4  ;;  %v999_v7 = vsel %vm833_vm8, nan, %v998_v5 }
0x142d   :  { %v844_v8 = vmul.f32 %v843_v6, %v1404_v24  ;;  %v1004_v57 = vmul.f32 %v1002_v63, %v999_v7 }
0x142f   :  { %v1005_v60 = vadd.f32 %v1004_v57, %v844_v8 }
0x1431   :  { %1007 = vst.msk [vmem:[%s1470_s3] sm:$0xff] %vm1006_vm9, %v1005_v60 }

</bundles_post_ra>
